<compile_context>
chip_gen: v6e
topology: v6e:2x2x1
jax: 0.10.0
libtpu: 0.0.40
codegen_flags: <defaults>
</compile_context>

<pallas_src>
import jax
import jax.numpy as jnp
from jax import lax
from jax.experimental import pallas as pl
from jax.experimental.pallas import tpu as pltpu


def _gate_combine(tg, c, H):
    """tg = tanh(gates) where the i/f/o column blocks of the gate weights and
    biases were pre-scaled by 0.5 at pack time, so sigmoid(raw) == 0.5*tg+0.5
    on those blocks and tanh(raw) == tg on the g block.  Gate order [i,f,g,o].
    Note: the (1,H) slices live at lane offsets 0/H/2H/3H; any relayouts the
    compiler inserts for f*c / i*g go to the XLU slot (latency-only)."""
    i = 0.5 * tg[:, 0 * H:1 * H] + 0.5
    f = 0.5 * tg[:, 1 * H:2 * H] + 0.5
    g = tg[:, 2 * H:3 * H]
    o = 0.5 * tg[:, 3 * H:4 * H] + 0.5
    c_new = f * c + i * g
    h_new = o * jnp.tanh(c_new)
    return h_new, c_new


def pplstm_kernel(x0_ref,      # SMEM (1,1)   first input scalar
                  bout_ref,    # SMEM (1,1)   output Linear bias
                  wih0_ref,    # VMEM (1,4H)  f32, 0.5-prescaled layer0 W_ih^T (t==0 only)
                  b0_ref,      # VMEM (1,4H)  f32, 0.5-prescaled layer0 bias   (t==0 only)
                  wh0_ref,     # VMEM (H,8H)  bf16, [wih1 | whh0] fused contribution of h0
                  wh1_ref,     # VMEM (H,8H)  bf16, [W_fb | whh1] fused contribution of h1
                  b0fold_ref,  # VMEM (1,4H)  f32, prescaled (b0 + bout*wih0) folded bias
                  b1_ref,      # VMEM (1,4H)  f32, prescaled layer1 bias
                  wout_ref,    # VMEM (1,H)   f32, output Linear weight
                  out_ref):    # SMEM (T,)    autoregressive outputs
    H = wout_ref.shape[1]
    G = 4 * H
    T = out_ref.shape[0]

    # H=32: each fused weight is 16 KiB bf16 (~8 vregs) -> hoisting is fine.
    # For much larger H, index the VMEM refs inside contrib() instead (keeping
    # H a multiple of 32 so the [:, :G]/[:, G:] slices stay vreg-aligned).
    wh0 = wh0_ref[...]
    wh1 = wh1_ref[...]
    b0fold = b0fold_ref[...]
    b1 = b1_ref[...]
    wout = wout_ref[...]
    bout = bout_ref[0, 0]
    x0 = x0_ref[0, 0]
    zH = jnp.zeros((1, H), jnp.float32)

    def contrib(h, w):
        # (1,H) f32 state -> (1,8H) f32 contributions: one bf16 MXU pass with
        # f32 accumulation.  First 4H lanes are the half consumed first.
        return jnp.dot(h.astype(jnp.bfloat16), w,
                       preferred_element_type=jnp.float32)

    # ---- t == 0 (peeled): real scalar input x0, zero initial state ----
    h0, c0 = _gate_combine(jnp.tanh(x0 * wih0_ref[...] + b0_ref[...]), zH, H)
    a0 = contrib(h0, wh0)
    h1, c1 = _gate_combine(jnp.tanh(a0[:, :G] + b1), zH, H)   # wih1 half pops first
    a1 = contrib(h1, wh1)
    out_ref[0] = jnp.sum(h1 * wout) + bout
    # bias pre-adds: issue as soon as each dot result is available -> they sit
    # off the next step's critical chain (LLO schedules them under this step's
    # remaining work once the loop is unrolled).
    p0 = a0[:, G:] + b0fold     # whh0 half + folded layer-0 bias (next step, layer 0)
    p1 = a1[:, G:] + b1         # whh1 half + layer-1 bias        (next step, layer 1)

    # ---- t >= 1: scalar feedback folded into the fused weights ----
    def body(t, carry):
        p0, p1, a1fb, c0, c1 = carry
        # layer 0: gates = h0_prev@whh0 + y_prev*wih0 + b0 (feedback + bias
        # folded into p0/a1fb) -> single on-chain add before the tanh.
        h0, c0 = _gate_combine(jnp.tanh(p0 + a1fb), c0, H)
        a0 = contrib(h0, wh0)
        # layer 1: gates = h0_new@wih1 + h1_prev@whh1 + b1; wih1 half is the
        # first half of a0 (packed to match MRF pop order on v5e/v6e).
        h1, c1 = _gate_combine(jnp.tanh(a0[:, :G] + p1), c1, H)
        a1 = contrib(h1, wh1)
        # output head: off the recurrence critical path (feedback is folded).
        out_ref[t] = jnp.sum(h1 * wout) + bout
        # pre-add biases for the NEXT step (off-chain).
        p0 = a0[:, G:] + b0fold
        p1 = a1[:, G:] + b1
        return (p0, p1, a1[:, :G], c0, c1)

    # Full unroll for small T (overlap y-reduce/SMEM store with next MXU work);
    # bounded unroll for long sequences (code size / vreg pressure).
    unroll = True if T <= 33 else 4
    lax.fori_loop(1, T, body, (p0, p1, a1[:, :G], c0, c1), unroll=unroll)


def _scale_ifo(w):
    """Scale the i/f/o column blocks (gate order [i,f,g,o]) of a (..., 4H)
    gate weight/bias by 0.5 so sigmoid(x) == 0.5*tanh(x_scaled)+0.5 can be
    computed with one full-width tanh.  0.5 is exact, so the later bf16 cast
    loses nothing beyond the original quantization."""
    H = w.shape[-1] // 4
    s = jnp.concatenate([jnp.full((H,), 0.5, w.dtype),
                         jnp.full((H,), 0.5, w.dtype),
                         jnp.ones((H,), w.dtype),
                         jnp.full((H,), 0.5, w.dtype)])
    return w * s


def pack_params(params):
    """Host-side packing: fuse the per-state matmuls, fold the scalar
    autoregressive feedback (y = h1 @ wout.T + bout) into layer-0 weights,
    pre-scale i/f/o gate columns by 0.5 (single-tanh nonlinearity), and order
    the fused columns so the half consumed first pops out of the MXU first."""
    f32 = jnp.float32
    wih0 = params["wih0"].astype(f32)   # (1,4H)
    whh0 = params["whh0"].astype(f32)   # (H,4H)
    b0 = params["b0"].astype(f32)       # (1,4H)
    wih1 = params["wih1"].astype(f32)   # (H,4H)
    whh1 = params["whh1"].astype(f32)   # (H,4H)
    b1 = params["b1"].astype(f32)       # (1,4H)
    wout = params["wout"].astype(f32)   # (1,H)
    bout = params["bout"].astype(f32)   # (1,1)

    # h1 @ W_fb == (h1 @ wout.T) * wih0  (exact rank-1 fold of the feedback).
    # Note: W_fb is bf16-quantized inside wh1; fine at small T, validate at
    # realistic sequence lengths if long-horizon accuracy matters.
    w_fb = wout.T @ wih0                                              # (H,4H)

    wh0 = jnp.concatenate([_scale_ifo(wih1), _scale_ifo(whh0)],
                          axis=1).astype(jnp.bfloat16)                # (H,8H)
    wh1 = jnp.concatenate([_scale_ifo(w_fb), _scale_ifo(whh1)],
                          axis=1).astype(jnp.bfloat16)                # (H,8H)
    b0fold = _scale_ifo(b0 + bout[0, 0] * wih0)                       # (1,4H)
    return dict(wih0=_scale_ifo(wih0), b0=_scale_ifo(b0),
                wh0=wh0, wh1=wh1, b0fold=b0fold, b1=_scale_ifo(b1),
                wout=wout, bout=bout)


def pplstm_forward(inputs, packed):
    """inputs: (T, 1, 1) float32; returns (T, 1, 1) float32."""
    T = inputs.shape[0]
    x0 = inputs[0, 0, 0].reshape(1, 1).astype(jnp.float32)

    vmem = pl.BlockSpec(memory_space=pltpu.MemorySpace.VMEM)
    smem = pl.BlockSpec(memory_space=pltpu.MemorySpace.SMEM)

    out = pl.pallas_call(
        pplstm_kernel,
        out_shape=jax.ShapeDtypeStruct((T,), jnp.float32),
        in_specs=[smem, smem, vmem, vmem, vmem, vmem, vmem, vmem, vmem],
        out_specs=smem,
    )(x0, packed["bout"],
      packed["wih0"], packed["b0"],
      packed["wh0"], packed["wh1"],
      packed["b0fold"], packed["b1"],
      packed["wout"])
    return out.reshape(T, 1, 1)


def pplstm_ref_packed(inputs, packed):
    """Pure-JAX emulation of exactly what the kernel computes (same bf16
    packed weights, same fused/folded/prescaled math, f32 accumulation)."""
    T = inputs.shape[0]
    H = packed["wout"].shape[1]
    G = 4 * H
    wih0, b0 = packed["wih0"], packed["b0"]
    wh0, wh1 = packed["wh0"], packed["wh1"]
    b0fold, b1 = packed["b0fold"], packed["b1"]
    wout, bout = packed["wout"], packed["bout"][0, 0]

    def contrib(h, w):
        return jnp.dot(h.astype(jnp.bfloat16), w,
                       preferred_element_type=jnp.float32)

    zH = jnp.zeros((1, H), jnp.float32)
    x0 = inputs[0, 0, 0]
    h0, c0 = _gate_combine(jnp.tanh(x0 * wih0 + b0), zH, H)
    a0 = contrib(h0, wh0)
    h1, c1 = _gate_combine(jnp.tanh(a0[:, :G] + b1), zH, H)
    a1 = contrib(h1, wh1)
    ys = [jnp.sum(h1 * wout) + bout]
    p0 = a0[:, G:] + b0fold
    p1 = a1[:, G:] + b1
    a1fb = a1[:, :G]
    for _ in range(1, T):
        h0, c0 = _gate_combine(jnp.tanh(p0 + a1fb), c0, H)
        a0 = contrib(h0, wh0)
        h1, c1 = _gate_combine(jnp.tanh(a0[:, :G] + p1), c1, H)
        a1 = contrib(h1, wh1)
        ys.append(jnp.sum(h1 * wout) + bout)
        p0 = a0[:, G:] + b0fold
        p1 = a1[:, G:] + b1
        a1fb = a1[:, :G]
    return jnp.stack(ys).reshape(T, 1, 1)


def _lstm_gate_ref(gates, c, H):
    """Original-style gate update (real sigmoid) for the f32 reference."""
    i = jax.nn.sigmoid(gates[:, 0 * H:1 * H])
    f = jax.nn.sigmoid(gates[:, 1 * H:2 * H])
    g = jnp.tanh(gates[:, 2 * H:3 * H])
    o = jax.nn.sigmoid(gates[:, 3 * H:4 * H])
    c_new = f * c + i * g
    h_new = o * jnp.tanh(c_new)
    return h_new, c_new


def pplstm_ref(inputs, params):
    """Original (unfolded, f32-weight) reference of the autoregressive forward."""
    T = inputs.shape[0]
    H = params["whh0"].shape[0]
    wih0, whh0, b0 = params["wih0"], params["whh0"], params["b0"]
    wih1, whh1, b1 = params["wih1"], params["whh1"], params["b1"]
    wout, bout = params["wout"], params["bout"]

    def step(carry, _):
        x, h0, c0, h1, c1 = carry
        g0 = x * wih0 + h0 @ whh0 + b0
        h0, c0 = _lstm_gate_ref(g0, c0, H)
        g1 = h0 @ wih1 + h1 @ whh1 + b1
        h1, c1 = _lstm_gate_ref(g1, c1, H)
        y = jnp.sum(h1 * wout) + bout[0, 0]
        return (y, h0, c0, h1, c1), y

    z = jnp.zeros((1, H), jnp.float32)
    _, ys = lax.scan(step, (inputs[0, 0, 0], z, z, z, z), None, length=T)
    return ys.reshape(T, 1, 1)


def init_params(key, hidden_size):
    """Deterministic init; shapes mirror nn.LSTM(1,H,num_layers=2)+Linear(H,1),
    stored pre-transposed (in_dim, 4H). Gate order [i,f,g,o]."""
    H = hidden_size
    k = jax.random.split(key, 9)
    s = 1.0 / jnp.sqrt(H)
    u = lambda kk, shape: jax.random.uniform(kk, shape, jnp.float32, -s, s)
    return {
        "wih0": u(k[0], (1, 4 * H)),    # = weight_ih_l0.T  (4H,1) -> (1,4H)
        "whh0": u(k[1], (H, 4 * H)),    # = weight_hh_l0.T
        "b0":   u(k[2], (1, 4 * H)),    # = bias_ih_l0 + bias_hh_l0
        "wih1": u(k[3], (H, 4 * H)),    # = weight_ih_l1.T
        "whh1": u(k[4], (H, 4 * H)),    # = weight_hh_l1.T
        "b1":   u(k[5], (1, 4 * H)),    # = bias_ih_l1 + bias_hh_l1
        "wout": u(k[6], (1, H)),        # = out.weight
        "bout": u(k[7], (1, 1)),        # = out.bias
    }


if __name__ == "__main__":
    # TODO(synk): only the default mode='LSTM' inference path is implemented;
    # 'LSTMCell' mode and the training-time full-sequence path are not.
    hidden_size = 32
    seq = 8

    key = jax.random.PRNGKey(0)
    kp, kx = jax.random.split(key)
    params = init_params(kp, hidden_size)
    inputs = jax.random.normal(kx, (seq, 1, 1), jnp.float32)  # (T, batch=1, feat=1)

    packed = pack_params(params)
    out = pplstm_forward(inputs, packed)
    out = jax.block_until_ready(out)
    assert out.shape == (seq, 1, 1)

    # Tight check: kernel matches a pure-JAX emulation of the same packed math.
    ref_exact = pplstm_ref_packed(inputs, packed)
    assert jnp.allclose(out, ref_exact, atol=1e-4, rtol=1e-4), (out, ref_exact)

    # Sanity check: folded/bf16/single-tanh fast path stays close to the
    # original f32 sigmoid/tanh recurrence.
    ref_f32 = pplstm_ref(inputs, params)
    assert jnp.allclose(out, ref_f32, atol=5e-2, rtol=5e-2), (out, ref_f32)

    print("KERNEL_OK")
</pallas_src>

<mosaic_0001>
module attributes {stable_mosaic.version = 11 : i64} {
  func.func @pplstm_kernel(%arg0: memref<1x1xf32, #tpu.memory_space<smem>>, %arg1: memref<1x1xf32, #tpu.memory_space<smem>>, %arg2: memref<1x128xf32, #tpu.memory_space<vmem>>, %arg3: memref<1x128xf32, #tpu.memory_space<vmem>>, %arg4: memref<32x256xbf16, #tpu.memory_space<vmem>>, %arg5: memref<32x256xbf16, #tpu.memory_space<vmem>>, %arg6: memref<1x128xf32, #tpu.memory_space<vmem>>, %arg7: memref<1x128xf32, #tpu.memory_space<vmem>>, %arg8: memref<1x32xf32, #tpu.memory_space<vmem>>, %arg9: memref<8xf32, #tpu.memory_space<smem>>) attributes {dimension_semantics = [], scalar_prefetch = 0 : i64, scratch_operands = 0 : i64, tpu.core_type = #tpu.core_type<tc>} {
    %c0 = arith.constant 0 : index
    %c0_0 = arith.constant 0 : index
    %0 = vector.load %arg4[%c0, %c0_0] : memref<32x256xbf16, #tpu.memory_space<vmem>>, vector<32x256xbf16>
    %c0_1 = arith.constant 0 : index
    %c0_2 = arith.constant 0 : index
    %1 = vector.load %arg5[%c0_1, %c0_2] : memref<32x256xbf16, #tpu.memory_space<vmem>>, vector<32x256xbf16>
    %c0_3 = arith.constant 0 : index
    %c0_4 = arith.constant 0 : index
    %2 = vector.load %arg6[%c0_3, %c0_4] : memref<1x128xf32, #tpu.memory_space<vmem>>, vector<1x128xf32>
    %c0_5 = arith.constant 0 : index
    %c0_6 = arith.constant 0 : index
    %3 = vector.load %arg7[%c0_5, %c0_6] : memref<1x128xf32, #tpu.memory_space<vmem>>, vector<1x128xf32>
    %c0_7 = arith.constant 0 : index
    %c0_8 = arith.constant 0 : index
    %4 = vector.load %arg8[%c0_7, %c0_8] : memref<1x32xf32, #tpu.memory_space<vmem>>, vector<1x32xf32>
    %c0_9 = arith.constant 0 : index
    %c0_10 = arith.constant 0 : index
    %5 = memref.load %arg1[%c0_9, %c0_10] : memref<1x1xf32, #tpu.memory_space<smem>>
    %c0_11 = arith.constant 0 : index
    %c0_12 = arith.constant 0 : index
    %6 = memref.load %arg0[%c0_11, %c0_12] : memref<1x1xf32, #tpu.memory_space<smem>>
    %cst = arith.constant 0.000000e+00 : f32
    %7 = vector.broadcast %cst : f32 to vector<1x32xf32>
    %c0_13 = arith.constant 0 : index
    %c0_14 = arith.constant 0 : index
    %8 = vector.load %arg2[%c0_13, %c0_14] : memref<1x128xf32, #tpu.memory_space<vmem>>, vector<1x128xf32>
    %9 = vector.broadcast %6 : f32 to vector<1x128xf32>
    %10 = arith.mulf %9, %8 : vector<1x128xf32>
    %c0_15 = arith.constant 0 : index
    %c0_16 = arith.constant 0 : index
    %11 = vector.load %arg3[%c0_15, %c0_16] : memref<1x128xf32, #tpu.memory_space<vmem>>, vector<1x128xf32>
    %12 = arith.addf %10, %11 : vector<1x128xf32>
    %13 = math.tanh %12 : vector<1x128xf32>
    %14 = vector.extract_strided_slice %13 {offsets = [0, 0], sizes = [1, 32], strides = [1, 1]} : vector<1x128xf32> to vector<1x32xf32>
    %cst_17 = arith.constant 5.000000e-01 : f32
    %15 = vector.broadcast %cst_17 : f32 to vector<1x32xf32>
    %16 = arith.mulf %15, %14 : vector<1x32xf32>
    %cst_18 = arith.constant 5.000000e-01 : f32
    %17 = vector.broadcast %cst_18 : f32 to vector<1x32xf32>
    %18 = arith.addf %16, %17 : vector<1x32xf32>
    %19 = vector.extract_strided_slice %13 {offsets = [0, 32], sizes = [1, 32], strides = [1, 1]} : vector<1x128xf32> to vector<1x32xf32>
    %cst_19 = arith.constant 5.000000e-01 : f32
    %20 = vector.broadcast %cst_19 : f32 to vector<1x32xf32>
    %21 = arith.mulf %20, %19 : vector<1x32xf32>
    %cst_20 = arith.constant 5.000000e-01 : f32
    %22 = vector.broadcast %cst_20 : f32 to vector<1x32xf32>
    %23 = arith.addf %21, %22 : vector<1x32xf32>
    %24 = vector.extract_strided_slice %13 {offsets = [0, 64], sizes = [1, 32], strides = [1, 1]} : vector<1x128xf32> to vector<1x32xf32>
    %25 = vector.extract_strided_slice %13 {offsets = [0, 96], sizes = [1, 32], strides = [1, 1]} : vector<1x128xf32> to vector<1x32xf32>
    %cst_21 = arith.constant 5.000000e-01 : f32
    %26 = vector.broadcast %cst_21 : f32 to vector<1x32xf32>
    %27 = arith.mulf %26, %25 : vector<1x32xf32>
    %cst_22 = arith.constant 5.000000e-01 : f32
    %28 = vector.broadcast %cst_22 : f32 to vector<1x32xf32>
    %29 = arith.addf %27, %28 : vector<1x32xf32>
    %30 = arith.mulf %23, %7 : vector<1x32xf32>
    %31 = arith.mulf %18, %24 : vector<1x32xf32>
    %32 = arith.addf %30, %31 : vector<1x32xf32>
    %33 = math.tanh %32 : vector<1x32xf32>
    %34 = arith.mulf %29, %33 : vector<1x32xf32>
    %35 = arith.truncf %34 : vector<1x32xf32> to vector<1x32xbf16>
    %cst_23 = arith.constant dense<0.000000e+00> : vector<1x256xf32>
    %36 = tpu.matmul %35, %0, %cst_23 {dimension_numbers = #tpu.dot_dimension_numbers<[1], [0], [0], [1], [0, 0, 1, 1], [], []>} : vector<1x32xbf16>, vector<32x256xbf16>, vector<1x256xf32> -> vector<1x256xf32>
    %37 = vector.extract_strided_slice %36 {offsets = [0, 0], sizes = [1, 128], strides = [1, 1]} : vector<1x256xf32> to vector<1x128xf32>
    %38 = arith.addf %37, %3 : vector<1x128xf32>
    %39 = math.tanh %38 : vector<1x128xf32>
    %40 = vector.extract_strided_slice %39 {offsets = [0, 0], sizes = [1, 32], strides = [1, 1]} : vector<1x128xf32> to vector<1x32xf32>
    %cst_24 = arith.constant 5.000000e-01 : f32
    %41 = vector.broadcast %cst_24 : f32 to vector<1x32xf32>
    %42 = arith.mulf %41, %40 : vector<1x32xf32>
    %cst_25 = arith.constant 5.000000e-01 : f32
    %43 = vector.broadcast %cst_25 : f32 to vector<1x32xf32>
    %44 = arith.addf %42, %43 : vector<1x32xf32>
    %45 = vector.extract_strided_slice %39 {offsets = [0, 32], sizes = [1, 32], strides = [1, 1]} : vector<1x128xf32> to vector<1x32xf32>
    %cst_26 = arith.constant 5.000000e-01 : f32
    %46 = vector.broadcast %cst_26 : f32 to vector<1x32xf32>
    %47 = arith.mulf %46, %45 : vector<1x32xf32>
    %cst_27 = arith.constant 5.000000e-01 : f32
    %48 = vector.broadcast %cst_27 : f32 to vector<1x32xf32>
    %49 = arith.addf %47, %48 : vector<1x32xf32>
    %50 = vector.extract_strided_slice %39 {offsets = [0, 64], sizes = [1, 32], strides = [1, 1]} : vector<1x128xf32> to vector<1x32xf32>
    %51 = vector.extract_strided_slice %39 {offsets = [0, 96], sizes = [1, 32], strides = [1, 1]} : vector<1x128xf32> to vector<1x32xf32>
    %cst_28 = arith.constant 5.000000e-01 : f32
    %52 = vector.broadcast %cst_28 : f32 to vector<1x32xf32>
    %53 = arith.mulf %52, %51 : vector<1x32xf32>
    %cst_29 = arith.constant 5.000000e-01 : f32
    %54 = vector.broadcast %cst_29 : f32 to vector<1x32xf32>
    %55 = arith.addf %53, %54 : vector<1x32xf32>
    %56 = arith.mulf %49, %7 : vector<1x32xf32>
    %57 = arith.mulf %44, %50 : vector<1x32xf32>
    %58 = arith.addf %56, %57 : vector<1x32xf32>
    %59 = math.tanh %58 : vector<1x32xf32>
    %60 = arith.mulf %55, %59 : vector<1x32xf32>
    %61 = arith.truncf %60 : vector<1x32xf32> to vector<1x32xbf16>
    %cst_30 = arith.constant dense<0.000000e+00> : vector<1x256xf32>
    %62 = tpu.matmul %61, %1, %cst_30 {dimension_numbers = #tpu.dot_dimension_numbers<[1], [0], [0], [1], [0, 0, 1, 1], [], []>} : vector<1x32xbf16>, vector<32x256xbf16>, vector<1x256xf32> -> vector<1x256xf32>
    %63 = arith.mulf %60, %4 : vector<1x32xf32>
    %64 = vector.shape_cast %63 : vector<1x32xf32> to vector<1x1x32xf32>
    %cst_31 = arith.constant dense<0.000000e+00> : vector<1xf32>
    %65 = vector.multi_reduction <add>, %64, %cst_31 [1, 2] : vector<1x1x32xf32> to vector<1xf32>
    %66 = vector.shape_cast %65 : vector<1xf32> to vector<1x1x1xf32>
    %67 = vector.extract %66[0, 0, 0] : f32 from vector<1x1x1xf32>
    %68 = arith.addf %67, %5 : f32
    %c0_32 = arith.constant 0 : index
    %69 = memref.load %arg9[%c0_32] : memref<8xf32, #tpu.memory_space<smem>>
    memref.store %68, %arg9[%c0_32] : memref<8xf32, #tpu.memory_space<smem>>
    %70 = vector.extract_strided_slice %36 {offsets = [0, 128], sizes = [1, 128], strides = [1, 1]} : vector<1x256xf32> to vector<1x128xf32>
    %71 = arith.addf %70, %2 : vector<1x128xf32>
    %72 = vector.extract_strided_slice %62 {offsets = [0, 128], sizes = [1, 128], strides = [1, 1]} : vector<1x256xf32> to vector<1x128xf32>
    %73 = arith.addf %72, %3 : vector<1x128xf32>
    %74 = vector.extract_strided_slice %62 {offsets = [0, 0], sizes = [1, 128], strides = [1, 1]} : vector<1x256xf32> to vector<1x128xf32>
    %c1_i32 = arith.constant 1 : i32
    %75 = arith.addf %71, %74 : vector<1x128xf32>
    %76 = math.tanh %75 : vector<1x128xf32>
    %77 = vector.extract_strided_slice %76 {offsets = [0, 0], sizes = [1, 32], strides = [1, 1]} : vector<1x128xf32> to vector<1x32xf32>
    %cst_33 = arith.constant 5.000000e-01 : f32
    %78 = vector.broadcast %cst_33 : f32 to vector<1x32xf32>
    %79 = arith.mulf %78, %77 : vector<1x32xf32>
    %cst_34 = arith.constant 5.000000e-01 : f32
    %80 = vector.broadcast %cst_34 : f32 to vector<1x32xf32>
    %81 = arith.addf %79, %80 : vector<1x32xf32>
    %82 = vector.extract_strided_slice %76 {offsets = [0, 32], sizes = [1, 32], strides = [1, 1]} : vector<1x128xf32> to vector<1x32xf32>
    %cst_35 = arith.constant 5.000000e-01 : f32
    %83 = vector.broadcast %cst_35 : f32 to vector<1x32xf32>
    %84 = arith.mulf %83, %82 : vector<1x32xf32>
    %cst_36 = arith.constant 5.000000e-01 : f32
    %85 = vector.broadcast %cst_36 : f32 to vector<1x32xf32>
    %86 = arith.addf %84, %85 : vector<1x32xf32>
    %87 = vector.extract_strided_slice %76 {offsets = [0, 64], sizes = [1, 32], strides = [1, 1]} : vector<1x128xf32> to vector<1x32xf32>
    %88 = vector.extract_strided_slice %76 {offsets = [0, 96], sizes = [1, 32], strides = [1, 1]} : vector<1x128xf32> to vector<1x32xf32>
    %cst_37 = arith.constant 5.000000e-01 : f32
    %89 = vector.broadcast %cst_37 : f32 to vector<1x32xf32>
    %90 = arith.mulf %89, %88 : vector<1x32xf32>
    %cst_38 = arith.constant 5.000000e-01 : f32
    %91 = vector.broadcast %cst_38 : f32 to vector<1x32xf32>
    %92 = arith.addf %90, %91 : vector<1x32xf32>
    %93 = arith.mulf %86, %32 : vector<1x32xf32>
    %94 = arith.mulf %81, %87 : vector<1x32xf32>
    %95 = arith.addf %93, %94 : vector<1x32xf32>
    %96 = math.tanh %95 : vector<1x32xf32>
    %97 = arith.mulf %92, %96 : vector<1x32xf32>
    %98 = arith.truncf %97 : vector<1x32xf32> to vector<1x32xbf16>
    %cst_39 = arith.constant dense<0.000000e+00> : vector<1x256xf32>
    %99 = tpu.matmul %98, %0, %cst_39 {dimension_numbers = #tpu.dot_dimension_numbers<[1], [0], [0], [1], [0, 0, 1, 1], [], []>} : vector<1x32xbf16>, vector<32x256xbf16>, vector<1x256xf32> -> vector<1x256xf32>
    %100 = vector.extract_strided_slice %99 {offsets = [0, 0], sizes = [1, 128], strides = [1, 1]} : vector<1x256xf32> to vector<1x128xf32>
    %101 = arith.addf %100, %73 : vector<1x128xf32>
    %102 = math.tanh %101 : vector<1x128xf32>
    %103 = vector.extract_strided_slice %102 {offsets = [0, 0], sizes = [1, 32], strides = [1, 1]} : vector<1x128xf32> to vector<1x32xf32>
    %cst_40 = arith.constant 5.000000e-01 : f32
    %104 = vector.broadcast %cst_40 : f32 to vector<1x32xf32>
    %105 = arith.mulf %104, %103 : vector<1x32xf32>
    %cst_41 = arith.constant 5.000000e-01 : f32
    %106 = vector.broadcast %cst_41 : f32 to vector<1x32xf32>
    %107 = arith.addf %105, %106 : vector<1x32xf32>
    %108 = vector.extract_strided_slice %102 {offsets = [0, 32], sizes = [1, 32], strides = [1, 1]} : vector<1x128xf32> to vector<1x32xf32>
    %cst_42 = arith.constant 5.000000e-01 : f32
    %109 = vector.broadcast %cst_42 : f32 to vector<1x32xf32>
    %110 = arith.mulf %109, %108 : vector<1x32xf32>
    %cst_43 = arith.constant 5.000000e-01 : f32
    %111 = vector.broadcast %cst_43 : f32 to vector<1x32xf32>
    %112 = arith.addf %110, %111 : vector<1x32xf32>
    %113 = vector.extract_strided_slice %102 {offsets = [0, 64], sizes = [1, 32], strides = [1, 1]} : vector<1x128xf32> to vector<1x32xf32>
    %114 = vector.extract_strided_slice %102 {offsets = [0, 96], sizes = [1, 32], strides = [1, 1]} : vector<1x128xf32> to vector<1x32xf32>
    %cst_44 = arith.constant 5.000000e-01 : f32
    %115 = vector.broadcast %cst_44 : f32 to vector<1x32xf32>
    %116 = arith.mulf %115, %114 : vector<1x32xf32>
    %cst_45 = arith.constant 5.000000e-01 : f32
    %117 = vector.broadcast %cst_45 : f32 to vector<1x32xf32>
    %118 = arith.addf %116, %117 : vector<1x32xf32>
    %119 = arith.mulf %112, %58 : vector<1x32xf32>
    %120 = arith.mulf %107, %113 : vector<1x32xf32>
    %121 = arith.addf %119, %120 : vector<1x32xf32>
    %122 = math.tanh %121 : vector<1x32xf32>
    %123 = arith.mulf %118, %122 : vector<1x32xf32>
    %124 = arith.truncf %123 : vector<1x32xf32> to vector<1x32xbf16>
    %cst_46 = arith.constant dense<0.000000e+00> : vector<1x256xf32>
    %125 = tpu.matmul %124, %1, %cst_46 {dimension_numbers = #tpu.dot_dimension_numbers<[1], [0], [0], [1], [0, 0, 1, 1], [], []>} : vector<1x32xbf16>, vector<32x256xbf16>, vector<1x256xf32> -> vector<1x256xf32>
    %126 = arith.mulf %123, %4 : vector<1x32xf32>
    %127 = vector.shape_cast %126 : vector<1x32xf32> to vector<1x1x32xf32>
    %cst_47 = arith.constant dense<0.000000e+00> : vector<1xf32>
    %128 = vector.multi_reduction <add>, %127, %cst_47 [1, 2] : vector<1x1x32xf32> to vector<1xf32>
    %129 = vector.shape_cast %128 : vector<1xf32> to vector<1x1x1xf32>
    %130 = vector.extract %129[0, 0, 0] : f32 from vector<1x1x1xf32>
    %131 = arith.addf %130, %5 : f32
    %132 = arith.index_cast %c1_i32 : i32 to index
    %133 = memref.load %arg9[%132] : memref<8xf32, #tpu.memory_space<smem>>
    memref.store %131, %arg9[%132] : memref<8xf32, #tpu.memory_space<smem>>
    %134 = vector.extract_strided_slice %99 {offsets = [0, 128], sizes = [1, 128], strides = [1, 1]} : vector<1x256xf32> to vector<1x128xf32>
    %135 = arith.addf %134, %2 : vector<1x128xf32>
    %136 = vector.extract_strided_slice %125 {offsets = [0, 128], sizes = [1, 128], strides = [1, 1]} : vector<1x256xf32> to vector<1x128xf32>
    %137 = arith.addf %136, %3 : vector<1x128xf32>
    %138 = vector.extract_strided_slice %125 {offsets = [0, 0], sizes = [1, 128], strides = [1, 1]} : vector<1x256xf32> to vector<1x128xf32>
    %c2_i32 = arith.constant 2 : i32
    %139 = arith.addf %135, %138 : vector<1x128xf32>
    %140 = math.tanh %139 : vector<1x128xf32>
    %141 = vector.extract_strided_slice %140 {offsets = [0, 0], sizes = [1, 32], strides = [1, 1]} : vector<1x128xf32> to vector<1x32xf32>
    %cst_48 = arith.constant 5.000000e-01 : f32
    %142 = vector.broadcast %cst_48 : f32 to vector<1x32xf32>
    %143 = arith.mulf %142, %141 : vector<1x32xf32>
    %cst_49 = arith.constant 5.000000e-01 : f32
    %144 = vector.broadcast %cst_49 : f32 to vector<1x32xf32>
    %145 = arith.addf %143, %144 : vector<1x32xf32>
    %146 = vector.extract_strided_slice %140 {offsets = [0, 32], sizes = [1, 32], strides = [1, 1]} : vector<1x128xf32> to vector<1x32xf32>
    %cst_50 = arith.constant 5.000000e-01 : f32
    %147 = vector.broadcast %cst_50 : f32 to vector<1x32xf32>
    %148 = arith.mulf %147, %146 : vector<1x32xf32>
    %cst_51 = arith.constant 5.000000e-01 : f32
    %149 = vector.broadcast %cst_51 : f32 to vector<1x32xf32>
    %150 = arith.addf %148, %149 : vector<1x32xf32>
    %151 = vector.extract_strided_slice %140 {offsets = [0, 64], sizes = [1, 32], strides = [1, 1]} : vector<1x128xf32> to vector<1x32xf32>
    %152 = vector.extract_strided_slice %140 {offsets = [0, 96], sizes = [1, 32], strides = [1, 1]} : vector<1x128xf32> to vector<1x32xf32>
    %cst_52 = arith.constant 5.000000e-01 : f32
    %153 = vector.broadcast %cst_52 : f32 to vector<1x32xf32>
    %154 = arith.mulf %153, %152 : vector<1x32xf32>
    %cst_53 = arith.constant 5.000000e-01 : f32
    %155 = vector.broadcast %cst_53 : f32 to vector<1x32xf32>
    %156 = arith.addf %154, %155 : vector<1x32xf32>
    %157 = arith.mulf %150, %95 : vector<1x32xf32>
    %158 = arith.mulf %145, %151 : vector<1x32xf32>
    %159 = arith.addf %157, %158 : vector<1x32xf32>
    %160 = math.tanh %159 : vector<1x32xf32>
    %161 = arith.mulf %156, %160 : vector<1x32xf32>
    %162 = arith.truncf %161 : vector<1x32xf32> to vector<1x32xbf16>
    %cst_54 = arith.constant dense<0.000000e+00> : vector<1x256xf32>
    %163 = tpu.matmul %162, %0, %cst_54 {dimension_numbers = #tpu.dot_dimension_numbers<[1], [0], [0], [1], [0, 0, 1, 1], [], []>} : vector<1x32xbf16>, vector<32x256xbf16>, vector<1x256xf32> -> vector<1x256xf32>
    %164 = vector.extract_strided_slice %163 {offsets = [0, 0], sizes = [1, 128], strides = [1, 1]} : vector<1x256xf32> to vector<1x128xf32>
    %165 = arith.addf %164, %137 : vector<1x128xf32>
    %166 = math.tanh %165 : vector<1x128xf32>
    %167 = vector.extract_strided_slice %166 {offsets = [0, 0], sizes = [1, 32], strides = [1, 1]} : vector<1x128xf32> to vector<1x32xf32>
    %cst_55 = arith.constant 5.000000e-01 : f32
    %168 = vector.broadcast %cst_55 : f32 to vector<1x32xf32>
    %169 = arith.mulf %168, %167 : vector<1x32xf32>
    %cst_56 = arith.constant 5.000000e-01 : f32
    %170 = vector.broadcast %cst_56 : f32 to vector<1x32xf32>
    %171 = arith.addf %169, %170 : vector<1x32xf32>
    %172 = vector.extract_strided_slice %166 {offsets = [0, 32], sizes = [1, 32], strides = [1, 1]} : vector<1x128xf32> to vector<1x32xf32>
    %cst_57 = arith.constant 5.000000e-01 : f32
    %173 = vector.broadcast %cst_57 : f32 to vector<1x32xf32>
    %174 = arith.mulf %173, %172 : vector<1x32xf32>
    %cst_58 = arith.constant 5.000000e-01 : f32
    %175 = vector.broadcast %cst_58 : f32 to vector<1x32xf32>
    %176 = arith.addf %174, %175 : vector<1x32xf32>
    %177 = vector.extract_strided_slice %166 {offsets = [0, 64], sizes = [1, 32], strides = [1, 1]} : vector<1x128xf32> to vector<1x32xf32>
    %178 = vector.extract_strided_slice %166 {offsets = [0, 96], sizes = [1, 32], strides = [1, 1]} : vector<1x128xf32> to vector<1x32xf32>
    %cst_59 = arith.constant 5.000000e-01 : f32
    %179 = vector.broadcast %cst_59 : f32 to vector<1x32xf32>
    %180 = arith.mulf %179, %178 : vector<1x32xf32>
    %cst_60 = arith.constant 5.000000e-01 : f32
    %181 = vector.broadcast %cst_60 : f32 to vector<1x32xf32>
    %182 = arith.addf %180, %181 : vector<1x32xf32>
    %183 = arith.mulf %176, %121 : vector<1x32xf32>
    %184 = arith.mulf %171, %177 : vector<1x32xf32>
    %185 = arith.addf %183, %184 : vector<1x32xf32>
    %186 = math.tanh %185 : vector<1x32xf32>
    %187 = arith.mulf %182, %186 : vector<1x32xf32>
    %188 = arith.truncf %187 : vector<1x32xf32> to vector<1x32xbf16>
    %cst_61 = arith.constant dense<0.000000e+00> : vector<1x256xf32>
    %189 = tpu.matmul %188, %1, %cst_61 {dimension_numbers = #tpu.dot_dimension_numbers<[1], [0], [0], [1], [0, 0, 1, 1], [], []>} : vector<1x32xbf16>, vector<32x256xbf16>, vector<1x256xf32> -> vector<1x256xf32>
    %190 = arith.mulf %187, %4 : vector<1x32xf32>
    %191 = vector.shape_cast %190 : vector<1x32xf32> to vector<1x1x32xf32>
    %cst_62 = arith.constant dense<0.000000e+00> : vector<1xf32>
    %192 = vector.multi_reduction <add>, %191, %cst_62 [1, 2] : vector<1x1x32xf32> to vector<1xf32>
    %193 = vector.shape_cast %192 : vector<1xf32> to vector<1x1x1xf32>
    %194 = vector.extract %193[0, 0, 0] : f32 from vector<1x1x1xf32>
    %195 = arith.addf %194, %5 : f32
    %196 = arith.index_cast %c2_i32 : i32 to index
    %197 = memref.load %arg9[%196] : memref<8xf32, #tpu.memory_space<smem>>
    memref.store %195, %arg9[%196] : memref<8xf32, #tpu.memory_space<smem>>
    %198 = vector.extract_strided_slice %163 {offsets = [0, 128], sizes = [1, 128], strides = [1, 1]} : vector<1x256xf32> to vector<1x128xf32>
    %199 = arith.addf %198, %2 : vector<1x128xf32>
    %200 = vector.extract_strided_slice %189 {offsets = [0, 128], sizes = [1, 128], strides = [1, 1]} : vector<1x256xf32> to vector<1x128xf32>
    %201 = arith.addf %200, %3 : vector<1x128xf32>
    %202 = vector.extract_strided_slice %189 {offsets = [0, 0], sizes = [1, 128], strides = [1, 1]} : vector<1x256xf32> to vector<1x128xf32>
    %c3_i32 = arith.constant 3 : i32
    %203 = arith.addf %199, %202 : vector<1x128xf32>
    %204 = math.tanh %203 : vector<1x128xf32>
    %205 = vector.extract_strided_slice %204 {offsets = [0, 0], sizes = [1, 32], strides = [1, 1]} : vector<1x128xf32> to vector<1x32xf32>
    %cst_63 = arith.constant 5.000000e-01 : f32
    %206 = vector.broadcast %cst_63 : f32 to vector<1x32xf32>
    %207 = arith.mulf %206, %205 : vector<1x32xf32>
    %cst_64 = arith.constant 5.000000e-01 : f32
    %208 = vector.broadcast %cst_64 : f32 to vector<1x32xf32>
    %209 = arith.addf %207, %208 : vector<1x32xf32>
    %210 = vector.extract_strided_slice %204 {offsets = [0, 32], sizes = [1, 32], strides = [1, 1]} : vector<1x128xf32> to vector<1x32xf32>
    %cst_65 = arith.constant 5.000000e-01 : f32
    %211 = vector.broadcast %cst_65 : f32 to vector<1x32xf32>
    %212 = arith.mulf %211, %210 : vector<1x32xf32>
    %cst_66 = arith.constant 5.000000e-01 : f32
    %213 = vector.broadcast %cst_66 : f32 to vector<1x32xf32>
    %214 = arith.addf %212, %213 : vector<1x32xf32>
    %215 = vector.extract_strided_slice %204 {offsets = [0, 64], sizes = [1, 32], strides = [1, 1]} : vector<1x128xf32> to vector<1x32xf32>
    %216 = vector.extract_strided_slice %204 {offsets = [0, 96], sizes = [1, 32], strides = [1, 1]} : vector<1x128xf32> to vector<1x32xf32>
    %cst_67 = arith.constant 5.000000e-01 : f32
    %217 = vector.broadcast %cst_67 : f32 to vector<1x32xf32>
    %218 = arith.mulf %217, %216 : vector<1x32xf32>
    %cst_68 = arith.constant 5.000000e-01 : f32
    %219 = vector.broadcast %cst_68 : f32 to vector<1x32xf32>
    %220 = arith.addf %218, %219 : vector<1x32xf32>
    %221 = arith.mulf %214, %159 : vector<1x32xf32>
    %222 = arith.mulf %209, %215 : vector<1x32xf32>
    %223 = arith.addf %221, %222 : vector<1x32xf32>
    %224 = math.tanh %223 : vector<1x32xf32>
    %225 = arith.mulf %220, %224 : vector<1x32xf32>
    %226 = arith.truncf %225 : vector<1x32xf32> to vector<1x32xbf16>
    %cst_69 = arith.constant dense<0.000000e+00> : vector<1x256xf32>
    %227 = tpu.matmul %226, %0, %cst_69 {dimension_numbers = #tpu.dot_dimension_numbers<[1], [0], [0], [1], [0, 0, 1, 1], [], []>} : vector<1x32xbf16>, vector<32x256xbf16>, vector<1x256xf32> -> vector<1x256xf32>
    %228 = vector.extract_strided_slice %227 {offsets = [0, 0], sizes = [1, 128], strides = [1, 1]} : vector<1x256xf32> to vector<1x128xf32>
    %229 = arith.addf %228, %201 : vector<1x128xf32>
    %230 = math.tanh %229 : vector<1x128xf32>
    %231 = vector.extract_strided_slice %230 {offsets = [0, 0], sizes = [1, 32], strides = [1, 1]} : vector<1x128xf32> to vector<1x32xf32>
    %cst_70 = arith.constant 5.000000e-01 : f32
    %232 = vector.broadcast %cst_70 : f32 to vector<1x32xf32>
    %233 = arith.mulf %232, %231 : vector<1x32xf32>
    %cst_71 = arith.constant 5.000000e-01 : f32
    %234 = vector.broadcast %cst_71 : f32 to vector<1x32xf32>
    %235 = arith.addf %233, %234 : vector<1x32xf32>
    %236 = vector.extract_strided_slice %230 {offsets = [0, 32], sizes = [1, 32], strides = [1, 1]} : vector<1x128xf32> to vector<1x32xf32>
    %cst_72 = arith.constant 5.000000e-01 : f32
    %237 = vector.broadcast %cst_72 : f32 to vector<1x32xf32>
    %238 = arith.mulf %237, %236 : vector<1x32xf32>
    %cst_73 = arith.constant 5.000000e-01 : f32
    %239 = vector.broadcast %cst_73 : f32 to vector<1x32xf32>
    %240 = arith.addf %238, %239 : vector<1x32xf32>
    %241 = vector.extract_strided_slice %230 {offsets = [0, 64], sizes = [1, 32], strides = [1, 1]} : vector<1x128xf32> to vector<1x32xf32>
    %242 = vector.extract_strided_slice %230 {offsets = [0, 96], sizes = [1, 32], strides = [1, 1]} : vector<1x128xf32> to vector<1x32xf32>
    %cst_74 = arith.constant 5.000000e-01 : f32
    %243 = vector.broadcast %cst_74 : f32 to vector<1x32xf32>
    %244 = arith.mulf %243, %242 : vector<1x32xf32>
    %cst_75 = arith.constant 5.000000e-01 : f32
    %245 = vector.broadcast %cst_75 : f32 to vector<1x32xf32>
    %246 = arith.addf %244, %245 : vector<1x32xf32>
    %247 = arith.mulf %240, %185 : vector<1x32xf32>
    %248 = arith.mulf %235, %241 : vector<1x32xf32>
    %249 = arith.addf %247, %248 : vector<1x32xf32>
    %250 = math.tanh %249 : vector<1x32xf32>
    %251 = arith.mulf %246, %250 : vector<1x32xf32>
    %252 = arith.truncf %251 : vector<1x32xf32> to vector<1x32xbf16>
    %cst_76 = arith.constant dense<0.000000e+00> : vector<1x256xf32>
    %253 = tpu.matmul %252, %1, %cst_76 {dimension_numbers = #tpu.dot_dimension_numbers<[1], [0], [0], [1], [0, 0, 1, 1], [], []>} : vector<1x32xbf16>, vector<32x256xbf16>, vector<1x256xf32> -> vector<1x256xf32>
    %254 = arith.mulf %251, %4 : vector<1x32xf32>
    %255 = vector.shape_cast %254 : vector<1x32xf32> to vector<1x1x32xf32>
    %cst_77 = arith.constant dense<0.000000e+00> : vector<1xf32>
    %256 = vector.multi_reduction <add>, %255, %cst_77 [1, 2] : vector<1x1x32xf32> to vector<1xf32>
    %257 = vector.shape_cast %256 : vector<1xf32> to vector<1x1x1xf32>
    %258 = vector.extract %257[0, 0, 0] : f32 from vector<1x1x1xf32>
    %259 = arith.addf %258, %5 : f32
    %260 = arith.index_cast %c3_i32 : i32 to index
    %261 = memref.load %arg9[%260] : memref<8xf32, #tpu.memory_space<smem>>
    memref.store %259, %arg9[%260] : memref<8xf32, #tpu.memory_space<smem>>
    %262 = vector.extract_strided_slice %227 {offsets = [0, 128], sizes = [1, 128], strides = [1, 1]} : vector<1x256xf32> to vector<1x128xf32>
    %263 = arith.addf %262, %2 : vector<1x128xf32>
    %264 = vector.extract_strided_slice %253 {offsets = [0, 128], sizes = [1, 128], strides = [1, 1]} : vector<1x256xf32> to vector<1x128xf32>
    %265 = arith.addf %264, %3 : vector<1x128xf32>
    %266 = vector.extract_strided_slice %253 {offsets = [0, 0], sizes = [1, 128], strides = [1, 1]} : vector<1x256xf32> to vector<1x128xf32>
    %c4_i32 = arith.constant 4 : i32
    %267 = arith.addf %263, %266 : vector<1x128xf32>
    %268 = math.tanh %267 : vector<1x128xf32>
    %269 = vector.extract_strided_slice %268 {offsets = [0, 0], sizes = [1, 32], strides = [1, 1]} : vector<1x128xf32> to vector<1x32xf32>
    %cst_78 = arith.constant 5.000000e-01 : f32
    %270 = vector.broadcast %cst_78 : f32 to vector<1x32xf32>
    %271 = arith.mulf %270, %269 : vector<1x32xf32>
    %cst_79 = arith.constant 5.000000e-01 : f32
    %272 = vector.broadcast %cst_79 : f32 to vector<1x32xf32>
    %273 = arith.addf %271, %272 : vector<1x32xf32>
    %274 = vector.extract_strided_slice %268 {offsets = [0, 32], sizes = [1, 32], strides = [1, 1]} : vector<1x128xf32> to vector<1x32xf32>
    %cst_80 = arith.constant 5.000000e-01 : f32
    %275 = vector.broadcast %cst_80 : f32 to vector<1x32xf32>
    %276 = arith.mulf %275, %274 : vector<1x32xf32>
    %cst_81 = arith.constant 5.000000e-01 : f32
    %277 = vector.broadcast %cst_81 : f32 to vector<1x32xf32>
    %278 = arith.addf %276, %277 : vector<1x32xf32>
    %279 = vector.extract_strided_slice %268 {offsets = [0, 64], sizes = [1, 32], strides = [1, 1]} : vector<1x128xf32> to vector<1x32xf32>
    %280 = vector.extract_strided_slice %268 {offsets = [0, 96], sizes = [1, 32], strides = [1, 1]} : vector<1x128xf32> to vector<1x32xf32>
    %cst_82 = arith.constant 5.000000e-01 : f32
    %281 = vector.broadcast %cst_82 : f32 to vector<1x32xf32>
    %282 = arith.mulf %281, %280 : vector<1x32xf32>
    %cst_83 = arith.constant 5.000000e-01 : f32
    %283 = vector.broadcast %cst_83 : f32 to vector<1x32xf32>
    %284 = arith.addf %282, %283 : vector<1x32xf32>
    %285 = arith.mulf %278, %223 : vector<1x32xf32>
    %286 = arith.mulf %273, %279 : vector<1x32xf32>
    %287 = arith.addf %285, %286 : vector<1x32xf32>
    %288 = math.tanh %287 : vector<1x32xf32>
    %289 = arith.mulf %284, %288 : vector<1x32xf32>
    %290 = arith.truncf %289 : vector<1x32xf32> to vector<1x32xbf16>
    %cst_84 = arith.constant dense<0.000000e+00> : vector<1x256xf32>
    %291 = tpu.matmul %290, %0, %cst_84 {dimension_numbers = #tpu.dot_dimension_numbers<[1], [0], [0], [1], [0, 0, 1, 1], [], []>} : vector<1x32xbf16>, vector<32x256xbf16>, vector<1x256xf32> -> vector<1x256xf32>
    %292 = vector.extract_strided_slice %291 {offsets = [0, 0], sizes = [1, 128], strides = [1, 1]} : vector<1x256xf32> to vector<1x128xf32>
    %293 = arith.addf %292, %265 : vector<1x128xf32>
    %294 = math.tanh %293 : vector<1x128xf32>
    %295 = vector.extract_strided_slice %294 {offsets = [0, 0], sizes = [1, 32], strides = [1, 1]} : vector<1x128xf32> to vector<1x32xf32>
    %cst_85 = arith.constant 5.000000e-01 : f32
    %296 = vector.broadcast %cst_85 : f32 to vector<1x32xf32>
    %297 = arith.mulf %296, %295 : vector<1x32xf32>
    %cst_86 = arith.constant 5.000000e-01 : f32
    %298 = vector.broadcast %cst_86 : f32 to vector<1x32xf32>
    %299 = arith.addf %297, %298 : vector<1x32xf32>
    %300 = vector.extract_strided_slice %294 {offsets = [0, 32], sizes = [1, 32], strides = [1, 1]} : vector<1x128xf32> to vector<1x32xf32>
    %cst_87 = arith.constant 5.000000e-01 : f32
    %301 = vector.broadcast %cst_87 : f32 to vector<1x32xf32>
    %302 = arith.mulf %301, %300 : vector<1x32xf32>
    %cst_88 = arith.constant 5.000000e-01 : f32
    %303 = vector.broadcast %cst_88 : f32 to vector<1x32xf32>
    %304 = arith.addf %302, %303 : vector<1x32xf32>
    %305 = vector.extract_strided_slice %294 {offsets = [0, 64], sizes = [1, 32], strides = [1, 1]} : vector<1x128xf32> to vector<1x32xf32>
    %306 = vector.extract_strided_slice %294 {offsets = [0, 96], sizes = [1, 32], strides = [1, 1]} : vector<1x128xf32> to vector<1x32xf32>
    %cst_89 = arith.constant 5.000000e-01 : f32
    %307 = vector.broadcast %cst_89 : f32 to vector<1x32xf32>
    %308 = arith.mulf %307, %306 : vector<1x32xf32>
    %cst_90 = arith.constant 5.000000e-01 : f32
    %309 = vector.broadcast %cst_90 : f32 to vector<1x32xf32>
    %310 = arith.addf %308, %309 : vector<1x32xf32>
    %311 = arith.mulf %304, %249 : vector<1x32xf32>
    %312 = arith.mulf %299, %305 : vector<1x32xf32>
    %313 = arith.addf %311, %312 : vector<1x32xf32>
    %314 = math.tanh %313 : vector<1x32xf32>
    %315 = arith.mulf %310, %314 : vector<1x32xf32>
    %316 = arith.truncf %315 : vector<1x32xf32> to vector<1x32xbf16>
    %cst_91 = arith.constant dense<0.000000e+00> : vector<1x256xf32>
    %317 = tpu.matmul %316, %1, %cst_91 {dimension_numbers = #tpu.dot_dimension_numbers<[1], [0], [0], [1], [0, 0, 1, 1], [], []>} : vector<1x32xbf16>, vector<32x256xbf16>, vector<1x256xf32> -> vector<1x256xf32>
    %318 = arith.mulf %315, %4 : vector<1x32xf32>
    %319 = vector.shape_cast %318 : vector<1x32xf32> to vector<1x1x32xf32>
    %cst_92 = arith.constant dense<0.000000e+00> : vector<1xf32>
    %320 = vector.multi_reduction <add>, %319, %cst_92 [1, 2] : vector<1x1x32xf32> to vector<1xf32>
    %321 = vector.shape_cast %320 : vector<1xf32> to vector<1x1x1xf32>
    %322 = vector.extract %321[0, 0, 0] : f32 from vector<1x1x1xf32>
    %323 = arith.addf %322, %5 : f32
    %324 = arith.index_cast %c4_i32 : i32 to index
    %325 = memref.load %arg9[%324] : memref<8xf32, #tpu.memory_space<smem>>
    memref.store %323, %arg9[%324] : memref<8xf32, #tpu.memory_space<smem>>
    %326 = vector.extract_strided_slice %291 {offsets = [0, 128], sizes = [1, 128], strides = [1, 1]} : vector<1x256xf32> to vector<1x128xf32>
    %327 = arith.addf %326, %2 : vector<1x128xf32>
    %328 = vector.extract_strided_slice %317 {offsets = [0, 128], sizes = [1, 128], strides = [1, 1]} : vector<1x256xf32> to vector<1x128xf32>
    %329 = arith.addf %328, %3 : vector<1x128xf32>
    %330 = vector.extract_strided_slice %317 {offsets = [0, 0], sizes = [1, 128], strides = [1, 1]} : vector<1x256xf32> to vector<1x128xf32>
    %c5_i32 = arith.constant 5 : i32
    %331 = arith.addf %327, %330 : vector<1x128xf32>
    %332 = math.tanh %331 : vector<1x128xf32>
    %333 = vector.extract_strided_slice %332 {offsets = [0, 0], sizes = [1, 32], strides = [1, 1]} : vector<1x128xf32> to vector<1x32xf32>
    %cst_93 = arith.constant 5.000000e-01 : f32
    %334 = vector.broadcast %cst_93 : f32 to vector<1x32xf32>
    %335 = arith.mulf %334, %333 : vector<1x32xf32>
    %cst_94 = arith.constant 5.000000e-01 : f32
    %336 = vector.broadcast %cst_94 : f32 to vector<1x32xf32>
    %337 = arith.addf %335, %336 : vector<1x32xf32>
    %338 = vector.extract_strided_slice %332 {offsets = [0, 32], sizes = [1, 32], strides = [1, 1]} : vector<1x128xf32> to vector<1x32xf32>
    %cst_95 = arith.constant 5.000000e-01 : f32
    %339 = vector.broadcast %cst_95 : f32 to vector<1x32xf32>
    %340 = arith.mulf %339, %338 : vector<1x32xf32>
    %cst_96 = arith.constant 5.000000e-01 : f32
    %341 = vector.broadcast %cst_96 : f32 to vector<1x32xf32>
    %342 = arith.addf %340, %341 : vector<1x32xf32>
    %343 = vector.extract_strided_slice %332 {offsets = [0, 64], sizes = [1, 32], strides = [1, 1]} : vector<1x128xf32> to vector<1x32xf32>
    %344 = vector.extract_strided_slice %332 {offsets = [0, 96], sizes = [1, 32], strides = [1, 1]} : vector<1x128xf32> to vector<1x32xf32>
    %cst_97 = arith.constant 5.000000e-01 : f32
    %345 = vector.broadcast %cst_97 : f32 to vector<1x32xf32>
    %346 = arith.mulf %345, %344 : vector<1x32xf32>
    %cst_98 = arith.constant 5.000000e-01 : f32
    %347 = vector.broadcast %cst_98 : f32 to vector<1x32xf32>
    %348 = arith.addf %346, %347 : vector<1x32xf32>
    %349 = arith.mulf %342, %287 : vector<1x32xf32>
    %350 = arith.mulf %337, %343 : vector<1x32xf32>
    %351 = arith.addf %349, %350 : vector<1x32xf32>
    %352 = math.tanh %351 : vector<1x32xf32>
    %353 = arith.mulf %348, %352 : vector<1x32xf32>
    %354 = arith.truncf %353 : vector<1x32xf32> to vector<1x32xbf16>
    %cst_99 = arith.constant dense<0.000000e+00> : vector<1x256xf32>
    %355 = tpu.matmul %354, %0, %cst_99 {dimension_numbers = #tpu.dot_dimension_numbers<[1], [0], [0], [1], [0, 0, 1, 1], [], []>} : vector<1x32xbf16>, vector<32x256xbf16>, vector<1x256xf32> -> vector<1x256xf32>
    %356 = vector.extract_strided_slice %355 {offsets = [0, 0], sizes = [1, 128], strides = [1, 1]} : vector<1x256xf32> to vector<1x128xf32>
    %357 = arith.addf %356, %329 : vector<1x128xf32>
    %358 = math.tanh %357 : vector<1x128xf32>
    %359 = vector.extract_strided_slice %358 {offsets = [0, 0], sizes = [1, 32], strides = [1, 1]} : vector<1x128xf32> to vector<1x32xf32>
    %cst_100 = arith.constant 5.000000e-01 : f32
    %360 = vector.broadcast %cst_100 : f32 to vector<1x32xf32>
    %361 = arith.mulf %360, %359 : vector<1x32xf32>
    %cst_101 = arith.constant 5.000000e-01 : f32
    %362 = vector.broadcast %cst_101 : f32 to vector<1x32xf32>
    %363 = arith.addf %361, %362 : vector<1x32xf32>
    %364 = vector.extract_strided_slice %358 {offsets = [0, 32], sizes = [1, 32], strides = [1, 1]} : vector<1x128xf32> to vector<1x32xf32>
    %cst_102 = arith.constant 5.000000e-01 : f32
    %365 = vector.broadcast %cst_102 : f32 to vector<1x32xf32>
    %366 = arith.mulf %365, %364 : vector<1x32xf32>
    %cst_103 = arith.constant 5.000000e-01 : f32
    %367 = vector.broadcast %cst_103 : f32 to vector<1x32xf32>
    %368 = arith.addf %366, %367 : vector<1x32xf32>
    %369 = vector.extract_strided_slice %358 {offsets = [0, 64], sizes = [1, 32], strides = [1, 1]} : vector<1x128xf32> to vector<1x32xf32>
    %370 = vector.extract_strided_slice %358 {offsets = [0, 96], sizes = [1, 32], strides = [1, 1]} : vector<1x128xf32> to vector<1x32xf32>
    %cst_104 = arith.constant 5.000000e-01 : f32
    %371 = vector.broadcast %cst_104 : f32 to vector<1x32xf32>
    %372 = arith.mulf %371, %370 : vector<1x32xf32>
    %cst_105 = arith.constant 5.000000e-01 : f32
    %373 = vector.broadcast %cst_105 : f32 to vector<1x32xf32>
    %374 = arith.addf %372, %373 : vector<1x32xf32>
    %375 = arith.mulf %368, %313 : vector<1x32xf32>
    %376 = arith.mulf %363, %369 : vector<1x32xf32>
    %377 = arith.addf %375, %376 : vector<1x32xf32>
    %378 = math.tanh %377 : vector<1x32xf32>
    %379 = arith.mulf %374, %378 : vector<1x32xf32>
    %380 = arith.truncf %379 : vector<1x32xf32> to vector<1x32xbf16>
    %cst_106 = arith.constant dense<0.000000e+00> : vector<1x256xf32>
    %381 = tpu.matmul %380, %1, %cst_106 {dimension_numbers = #tpu.dot_dimension_numbers<[1], [0], [0], [1], [0, 0, 1, 1], [], []>} : vector<1x32xbf16>, vector<32x256xbf16>, vector<1x256xf32> -> vector<1x256xf32>
    %382 = arith.mulf %379, %4 : vector<1x32xf32>
    %383 = vector.shape_cast %382 : vector<1x32xf32> to vector<1x1x32xf32>
    %cst_107 = arith.constant dense<0.000000e+00> : vector<1xf32>
    %384 = vector.multi_reduction <add>, %383, %cst_107 [1, 2] : vector<1x1x32xf32> to vector<1xf32>
    %385 = vector.shape_cast %384 : vector<1xf32> to vector<1x1x1xf32>
    %386 = vector.extract %385[0, 0, 0] : f32 from vector<1x1x1xf32>
    %387 = arith.addf %386, %5 : f32
    %388 = arith.index_cast %c5_i32 : i32 to index
    %389 = memref.load %arg9[%388] : memref<8xf32, #tpu.memory_space<smem>>
    memref.store %387, %arg9[%388] : memref<8xf32, #tpu.memory_space<smem>>
    %390 = vector.extract_strided_slice %355 {offsets = [0, 128], sizes = [1, 128], strides = [1, 1]} : vector<1x256xf32> to vector<1x128xf32>
    %391 = arith.addf %390, %2 : vector<1x128xf32>
    %392 = vector.extract_strided_slice %381 {offsets = [0, 128], sizes = [1, 128], strides = [1, 1]} : vector<1x256xf32> to vector<1x128xf32>
    %393 = arith.addf %392, %3 : vector<1x128xf32>
    %394 = vector.extract_strided_slice %381 {offsets = [0, 0], sizes = [1, 128], strides = [1, 1]} : vector<1x256xf32> to vector<1x128xf32>
    %c6_i32 = arith.constant 6 : i32
    %395 = arith.addf %391, %394 : vector<1x128xf32>
    %396 = math.tanh %395 : vector<1x128xf32>
    %397 = vector.extract_strided_slice %396 {offsets = [0, 0], sizes = [1, 32], strides = [1, 1]} : vector<1x128xf32> to vector<1x32xf32>
    %cst_108 = arith.constant 5.000000e-01 : f32
    %398 = vector.broadcast %cst_108 : f32 to vector<1x32xf32>
    %399 = arith.mulf %398, %397 : vector<1x32xf32>
    %cst_109 = arith.constant 5.000000e-01 : f32
    %400 = vector.broadcast %cst_109 : f32 to vector<1x32xf32>
    %401 = arith.addf %399, %400 : vector<1x32xf32>
    %402 = vector.extract_strided_slice %396 {offsets = [0, 32], sizes = [1, 32], strides = [1, 1]} : vector<1x128xf32> to vector<1x32xf32>
    %cst_110 = arith.constant 5.000000e-01 : f32
    %403 = vector.broadcast %cst_110 : f32 to vector<1x32xf32>
    %404 = arith.mulf %403, %402 : vector<1x32xf32>
    %cst_111 = arith.constant 5.000000e-01 : f32
    %405 = vector.broadcast %cst_111 : f32 to vector<1x32xf32>
    %406 = arith.addf %404, %405 : vector<1x32xf32>
    %407 = vector.extract_strided_slice %396 {offsets = [0, 64], sizes = [1, 32], strides = [1, 1]} : vector<1x128xf32> to vector<1x32xf32>
    %408 = vector.extract_strided_slice %396 {offsets = [0, 96], sizes = [1, 32], strides = [1, 1]} : vector<1x128xf32> to vector<1x32xf32>
    %cst_112 = arith.constant 5.000000e-01 : f32
    %409 = vector.broadcast %cst_112 : f32 to vector<1x32xf32>
    %410 = arith.mulf %409, %408 : vector<1x32xf32>
    %cst_113 = arith.constant 5.000000e-01 : f32
    %411 = vector.broadcast %cst_113 : f32 to vector<1x32xf32>
    %412 = arith.addf %410, %411 : vector<1x32xf32>
    %413 = arith.mulf %406, %351 : vector<1x32xf32>
    %414 = arith.mulf %401, %407 : vector<1x32xf32>
    %415 = arith.addf %413, %414 : vector<1x32xf32>
    %416 = math.tanh %415 : vector<1x32xf32>
    %417 = arith.mulf %412, %416 : vector<1x32xf32>
    %418 = arith.truncf %417 : vector<1x32xf32> to vector<1x32xbf16>
    %cst_114 = arith.constant dense<0.000000e+00> : vector<1x256xf32>
    %419 = tpu.matmul %418, %0, %cst_114 {dimension_numbers = #tpu.dot_dimension_numbers<[1], [0], [0], [1], [0, 0, 1, 1], [], []>} : vector<1x32xbf16>, vector<32x256xbf16>, vector<1x256xf32> -> vector<1x256xf32>
    %420 = vector.extract_strided_slice %419 {offsets = [0, 0], sizes = [1, 128], strides = [1, 1]} : vector<1x256xf32> to vector<1x128xf32>
    %421 = arith.addf %420, %393 : vector<1x128xf32>
    %422 = math.tanh %421 : vector<1x128xf32>
    %423 = vector.extract_strided_slice %422 {offsets = [0, 0], sizes = [1, 32], strides = [1, 1]} : vector<1x128xf32> to vector<1x32xf32>
    %cst_115 = arith.constant 5.000000e-01 : f32
    %424 = vector.broadcast %cst_115 : f32 to vector<1x32xf32>
    %425 = arith.mulf %424, %423 : vector<1x32xf32>
    %cst_116 = arith.constant 5.000000e-01 : f32
    %426 = vector.broadcast %cst_116 : f32 to vector<1x32xf32>
    %427 = arith.addf %425, %426 : vector<1x32xf32>
    %428 = vector.extract_strided_slice %422 {offsets = [0, 32], sizes = [1, 32], strides = [1, 1]} : vector<1x128xf32> to vector<1x32xf32>
    %cst_117 = arith.constant 5.000000e-01 : f32
    %429 = vector.broadcast %cst_117 : f32 to vector<1x32xf32>
    %430 = arith.mulf %429, %428 : vector<1x32xf32>
    %cst_118 = arith.constant 5.000000e-01 : f32
    %431 = vector.broadcast %cst_118 : f32 to vector<1x32xf32>
    %432 = arith.addf %430, %431 : vector<1x32xf32>
    %433 = vector.extract_strided_slice %422 {offsets = [0, 64], sizes = [1, 32], strides = [1, 1]} : vector<1x128xf32> to vector<1x32xf32>
    %434 = vector.extract_strided_slice %422 {offsets = [0, 96], sizes = [1, 32], strides = [1, 1]} : vector<1x128xf32> to vector<1x32xf32>
    %cst_119 = arith.constant 5.000000e-01 : f32
    %435 = vector.broadcast %cst_119 : f32 to vector<1x32xf32>
    %436 = arith.mulf %435, %434 : vector<1x32xf32>
    %cst_120 = arith.constant 5.000000e-01 : f32
    %437 = vector.broadcast %cst_120 : f32 to vector<1x32xf32>
    %438 = arith.addf %436, %437 : vector<1x32xf32>
    %439 = arith.mulf %432, %377 : vector<1x32xf32>
    %440 = arith.mulf %427, %433 : vector<1x32xf32>
    %441 = arith.addf %439, %440 : vector<1x32xf32>
    %442 = math.tanh %441 : vector<1x32xf32>
    %443 = arith.mulf %438, %442 : vector<1x32xf32>
    %444 = arith.truncf %443 : vector<1x32xf32> to vector<1x32xbf16>
    %cst_121 = arith.constant dense<0.000000e+00> : vector<1x256xf32>
    %445 = tpu.matmul %444, %1, %cst_121 {dimension_numbers = #tpu.dot_dimension_numbers<[1], [0], [0], [1], [0, 0, 1, 1], [], []>} : vector<1x32xbf16>, vector<32x256xbf16>, vector<1x256xf32> -> vector<1x256xf32>
    %446 = arith.mulf %443, %4 : vector<1x32xf32>
    %447 = vector.shape_cast %446 : vector<1x32xf32> to vector<1x1x32xf32>
    %cst_122 = arith.constant dense<0.000000e+00> : vector<1xf32>
    %448 = vector.multi_reduction <add>, %447, %cst_122 [1, 2] : vector<1x1x32xf32> to vector<1xf32>
    %449 = vector.shape_cast %448 : vector<1xf32> to vector<1x1x1xf32>
    %450 = vector.extract %449[0, 0, 0] : f32 from vector<1x1x1xf32>
    %451 = arith.addf %450, %5 : f32
    %452 = arith.index_cast %c6_i32 : i32 to index
    %453 = memref.load %arg9[%452] : memref<8xf32, #tpu.memory_space<smem>>
    memref.store %451, %arg9[%452] : memref<8xf32, #tpu.memory_space<smem>>
    %454 = vector.extract_strided_slice %419 {offsets = [0, 128], sizes = [1, 128], strides = [1, 1]} : vector<1x256xf32> to vector<1x128xf32>
    %455 = arith.addf %454, %2 : vector<1x128xf32>
    %456 = vector.extract_strided_slice %445 {offsets = [0, 128], sizes = [1, 128], strides = [1, 1]} : vector<1x256xf32> to vector<1x128xf32>
    %457 = arith.addf %456, %3 : vector<1x128xf32>
    %458 = vector.extract_strided_slice %445 {offsets = [0, 0], sizes = [1, 128], strides = [1, 1]} : vector<1x256xf32> to vector<1x128xf32>
    %c7_i32 = arith.constant 7 : i32
    %459 = arith.addf %455, %458 : vector<1x128xf32>
    %460 = math.tanh %459 : vector<1x128xf32>
    %461 = vector.extract_strided_slice %460 {offsets = [0, 0], sizes = [1, 32], strides = [1, 1]} : vector<1x128xf32> to vector<1x32xf32>
    %cst_123 = arith.constant 5.000000e-01 : f32
    %462 = vector.broadcast %cst_123 : f32 to vector<1x32xf32>
    %463 = arith.mulf %462, %461 : vector<1x32xf32>
    %cst_124 = arith.constant 5.000000e-01 : f32
    %464 = vector.broadcast %cst_124 : f32 to vector<1x32xf32>
    %465 = arith.addf %463, %464 : vector<1x32xf32>
    %466 = vector.extract_strided_slice %460 {offsets = [0, 32], sizes = [1, 32], strides = [1, 1]} : vector<1x128xf32> to vector<1x32xf32>
    %cst_125 = arith.constant 5.000000e-01 : f32
    %467 = vector.broadcast %cst_125 : f32 to vector<1x32xf32>
    %468 = arith.mulf %467, %466 : vector<1x32xf32>
    %cst_126 = arith.constant 5.000000e-01 : f32
    %469 = vector.broadcast %cst_126 : f32 to vector<1x32xf32>
    %470 = arith.addf %468, %469 : vector<1x32xf32>
    %471 = vector.extract_strided_slice %460 {offsets = [0, 64], sizes = [1, 32], strides = [1, 1]} : vector<1x128xf32> to vector<1x32xf32>
    %472 = vector.extract_strided_slice %460 {offsets = [0, 96], sizes = [1, 32], strides = [1, 1]} : vector<1x128xf32> to vector<1x32xf32>
    %cst_127 = arith.constant 5.000000e-01 : f32
    %473 = vector.broadcast %cst_127 : f32 to vector<1x32xf32>
    %474 = arith.mulf %473, %472 : vector<1x32xf32>
    %cst_128 = arith.constant 5.000000e-01 : f32
    %475 = vector.broadcast %cst_128 : f32 to vector<1x32xf32>
    %476 = arith.addf %474, %475 : vector<1x32xf32>
    %477 = arith.mulf %470, %415 : vector<1x32xf32>
    %478 = arith.mulf %465, %471 : vector<1x32xf32>
    %479 = arith.addf %477, %478 : vector<1x32xf32>
    %480 = math.tanh %479 : vector<1x32xf32>
    %481 = arith.mulf %476, %480 : vector<1x32xf32>
    %482 = arith.truncf %481 : vector<1x32xf32> to vector<1x32xbf16>
    %cst_129 = arith.constant dense<0.000000e+00> : vector<1x256xf32>
    %483 = tpu.matmul %482, %0, %cst_129 {dimension_numbers = #tpu.dot_dimension_numbers<[1], [0], [0], [1], [0, 0, 1, 1], [], []>} : vector<1x32xbf16>, vector<32x256xbf16>, vector<1x256xf32> -> vector<1x256xf32>
    %484 = vector.extract_strided_slice %483 {offsets = [0, 0], sizes = [1, 128], strides = [1, 1]} : vector<1x256xf32> to vector<1x128xf32>
    %485 = arith.addf %484, %457 : vector<1x128xf32>
    %486 = math.tanh %485 : vector<1x128xf32>
    %487 = vector.extract_strided_slice %486 {offsets = [0, 0], sizes = [1, 32], strides = [1, 1]} : vector<1x128xf32> to vector<1x32xf32>
    %cst_130 = arith.constant 5.000000e-01 : f32
    %488 = vector.broadcast %cst_130 : f32 to vector<1x32xf32>
    %489 = arith.mulf %488, %487 : vector<1x32xf32>
    %cst_131 = arith.constant 5.000000e-01 : f32
    %490 = vector.broadcast %cst_131 : f32 to vector<1x32xf32>
    %491 = arith.addf %489, %490 : vector<1x32xf32>
    %492 = vector.extract_strided_slice %486 {offsets = [0, 32], sizes = [1, 32], strides = [1, 1]} : vector<1x128xf32> to vector<1x32xf32>
    %cst_132 = arith.constant 5.000000e-01 : f32
    %493 = vector.broadcast %cst_132 : f32 to vector<1x32xf32>
    %494 = arith.mulf %493, %492 : vector<1x32xf32>
    %cst_133 = arith.constant 5.000000e-01 : f32
    %495 = vector.broadcast %cst_133 : f32 to vector<1x32xf32>
    %496 = arith.addf %494, %495 : vector<1x32xf32>
    %497 = vector.extract_strided_slice %486 {offsets = [0, 64], sizes = [1, 32], strides = [1, 1]} : vector<1x128xf32> to vector<1x32xf32>
    %498 = vector.extract_strided_slice %486 {offsets = [0, 96], sizes = [1, 32], strides = [1, 1]} : vector<1x128xf32> to vector<1x32xf32>
    %cst_134 = arith.constant 5.000000e-01 : f32
    %499 = vector.broadcast %cst_134 : f32 to vector<1x32xf32>
    %500 = arith.mulf %499, %498 : vector<1x32xf32>
    %cst_135 = arith.constant 5.000000e-01 : f32
    %501 = vector.broadcast %cst_135 : f32 to vector<1x32xf32>
    %502 = arith.addf %500, %501 : vector<1x32xf32>
    %503 = arith.mulf %496, %441 : vector<1x32xf32>
    %504 = arith.mulf %491, %497 : vector<1x32xf32>
    %505 = arith.addf %503, %504 : vector<1x32xf32>
    %506 = math.tanh %505 : vector<1x32xf32>
    %507 = arith.mulf %502, %506 : vector<1x32xf32>
    %508 = arith.truncf %507 : vector<1x32xf32> to vector<1x32xbf16>
    %cst_136 = arith.constant dense<0.000000e+00> : vector<1x256xf32>
    %509 = tpu.matmul %508, %1, %cst_136 {dimension_numbers = #tpu.dot_dimension_numbers<[1], [0], [0], [1], [0, 0, 1, 1], [], []>} : vector<1x32xbf16>, vector<32x256xbf16>, vector<1x256xf32> -> vector<1x256xf32>
    %510 = arith.mulf %507, %4 : vector<1x32xf32>
    %511 = vector.shape_cast %510 : vector<1x32xf32> to vector<1x1x32xf32>
    %cst_137 = arith.constant dense<0.000000e+00> : vector<1xf32>
    %512 = vector.multi_reduction <add>, %511, %cst_137 [1, 2] : vector<1x1x32xf32> to vector<1xf32>
    %513 = vector.shape_cast %512 : vector<1xf32> to vector<1x1x1xf32>
    %514 = vector.extract %513[0, 0, 0] : f32 from vector<1x1x1xf32>
    %515 = arith.addf %514, %5 : f32
    %516 = arith.index_cast %c7_i32 : i32 to index
    %517 = memref.load %arg9[%516] : memref<8xf32, #tpu.memory_space<smem>>
    memref.store %515, %arg9[%516] : memref<8xf32, #tpu.memory_space<smem>>
    %518 = vector.extract_strided_slice %483 {offsets = [0, 128], sizes = [1, 128], strides = [1, 1]} : vector<1x256xf32> to vector<1x128xf32>
    %519 = arith.addf %518, %2 : vector<1x128xf32>
    %520 = vector.extract_strided_slice %509 {offsets = [0, 128], sizes = [1, 128], strides = [1, 1]} : vector<1x256xf32> to vector<1x128xf32>
    %521 = arith.addf %520, %3 : vector<1x128xf32>
    %522 = vector.extract_strided_slice %509 {offsets = [0, 0], sizes = [1, 128], strides = [1, 1]} : vector<1x256xf32> to vector<1x128xf32>
    %c7_i32_138 = arith.constant 7 : i32
    return
  }
}

</mosaic_0001>

<bundles_post_ra>
// kernel: tpu_custom_call.1
= control target key start
LH: loop header
LB: loop body
LE: loop exit
PB: predicated region body
PF: predicated region fallthrough
CT: control target
= control target key end

     0   :  { %16 = vsyncpa [#allocation5], 0  ;;  %s1895_s0 = inlined_call_operand.<no memory space> [shape: f32[1,1], index: 0, kind: input, shape index: {}]   ;;  %s1896_s1 = inlined_call_operand.<no memory space> [shape: f32[1,1], index: 1, kind: input, shape index: {}]   ;;  %s1897_s2 = inlined_call_operand.vmem [shape: f32[1,128], index: 2, kind: input, shape index: {}]   ;;  %s1898_s3 = inlined_call_operand.vmem [shape: f32[1,128], index: 3, kind: input, shape index: {}]   ;;  %s1899_s4 = inlined_call_operand.hbm [shape: bf16[32,256], index: 4, kind: input, shape index: {}]   ;;  %s1900_s5 = inlined_call_operand.hbm [shape: bf16[32,256], index: 5, kind: input, shape index: {}]   ;;  %s1901_s6 = inlined_call_operand.vmem [shape: f32[1,128], index: 6, kind: input, shape index: {}]   ;;  %s1902_s7 = inlined_call_operand.vmem [shape: f32[1,128], index: 7, kind: input, shape index: {}]   ;;  %s1903_s8 = inlined_call_operand.vmem [shape: f32[1,32], index: 8, kind: input, shape index: {}]   ;;  %s1904_s9 = inlined_call_operand.hbm [shape: f32[8], index: 9, kind: output, shape index: {}]  }
   0x1   :  { %17 = vsyncpa [#allocation8], 0 }
   0x2   :  { %18 = vsyncpa [#allocation6], 0  ;;  %s1538_s30 = smov [#allocation4]  }
   0x3   :  { %s32_s10 = sshll.u32 %s1538_s30, 4  ;;  %s33_s10 = int_to_ptr.vmem [resolvable:$true] %s32_s10 }
   0x4   :  { %s1492_s11 = scalar_lea.vmem %s33_s10, 512  ;;  %p1497_p1 = scmp.lt.s32.totalorder %s33_s10, %s33_s10 }
   0x5   :  { %p1493_p0 = scmp.ne.s32.totalorder %s33_s10, %s1492_s11  ;;  %p1498_p2 = scmp.lt.s32.totalorder %s1492_s11, %s1492_s11 }
   0x7   :  { %p1499_p3 = por %p1498_p2, %p1497_p1 }
   0x9   :  { %p1500_p4 = pnand %p1499_p3, %p1493_p0 }
   0xb   :  { %1503 = shalt.err (!%p1500_p4)
}
   0xc   :  { %s1539_s12 = smov 128   ;;  %s1540_s13 = smov 8  }
   0xd   :  { %38 = dma.hbm_to_vmem [thread:$0]  %s1899_s4, 512, %s33_s10, [#allocation5], %s1539_s12, %s1539_s12, %s1540_s13  }
   0xe   :  { %s1541_s16 = smov [#allocation7]  }
   0xf   :  { %s44_s17 = sshll.u32 %s1541_s16, 4  ;;  %s45_s17 = int_to_ptr.vmem [resolvable:$true] %s44_s17 }
  0x10   :  { %s1512_s18 = scalar_lea.vmem %s45_s17, 512  ;;  %p1517_p6 = scmp.lt.s32.totalorder %s45_s17, %s45_s17 }
  0x11   :  { %p1513_p5 = scmp.ne.s32.totalorder %s45_s17, %s1512_s18  ;;  %p1518_p7 = scmp.lt.s32.totalorder %s1512_s18, %s1512_s18 }
  0x13   :  { %p1519_p8 = por %p1518_p7, %p1517_p6 }
  0x15   :  { %p1520_p9 = pnand %p1519_p8, %p1513_p5 }
  0x17   :  { %1523 = shalt.err (!%p1520_p9)
}
  0x18   :  { %50 = dma.hbm_to_vmem [thread:$0]  %s1900_s5, 512, %s45_s17, [#allocation8], %s1539_s12, %s1539_s12, %s1540_s13  }
  0x19   :  { %1532 = dma.done.wait [#allocation5], 512  }
  0x1a   :  { %1533 = vsyncadd [#allocation5], 4294966784 }
  0x1b   :  { %1534 = dma.done.wait [#allocation8], 512  }
  0x1c   :  { %1535 = vsyncadd [#allocation8], 4294966784  ;;  %v78_v0 = vstv %s1895_s0  ;;  %v77_v1 = vld [vmem:[%s1897_s2] sm:$0x1]  ;;  %s1542_s5 = smov 64   ;;  %s1543_s0 = smov 32  }
  0x1d   :  { %v80_v2 = vld [vmem:[%s1898_s3] sm:$0x1]  ;;  %v79_v3 = vmul.f32 %v78_v0, %v77_v1  ;;  %v1617_v13 = vld [vmem:[#allocation4 + $0x14] ss:$8 sps:$4 sm:$0xff]   ;;  %v1619_v14 = vld [vmem:[#allocation4 + $0x10] ss:$8 sps:$4 sm:$0xff]  }
  0x1e   :  { %v1621_v15 = vld [vmem:[#allocation4 + $0x4] ss:$8 sps:$4 sm:$0xff]   ;;  %142 = vmatprep.subr.bf16.mxu0 %v1617_v13  ;;  %v1544_v16 = vmov 0   ;;  %v1626_v17 = vld [vmem:[#allocation4] ss:$8 sps:$4 sm:$0xff]   ;;  %vm126_vm0 = vcmask 261120  }
  0x1f   :  { %v81_v4 = vadd.f32 %v80_v2, %v79_v3  ;;  %162 = vmatprep.mubr.bf16.mxu0 %v1544_v16  ;;  %143 = vmatpush1.bf16.msra.mxu0 %v1619_v14  ;;  %v1643_v23 = vld [vmem:[%s1902_s7] sm:$0x1]  ;;  %v1651_v37 = vld [vmem:[#allocation7 + $0x14] ss:$8 sps:$4 sm:$0xff]   ;;  %v1653_v38 = vld [vmem:[#allocation7 + $0x10] ss:$8 sps:$4 sm:$0xff]  }
  0x20   :  { %251 = vmatprep.mubr.bf16.mxu1 %v1544_v16  ;;  %144 = vmatprep.subr.bf16.mxu0 %v1621_v15  ;;  %v1655_v39 = vld [vmem:[#allocation7 + $0x4] ss:$8 sps:$4 sm:$0xff]   ;;  %v1659_v40 = vld [vmem:[#allocation7] ss:$8 sps:$4 sm:$0xff]   ;;  %s1545_s28 = smov 96   ;;  %vm273_vm1 = vcmask 253952  }
  0x21   :  { %1420 = vtanh.f32 %v81_v4  ;;  %231 = vmatprep.subr.bf16.mxu1 %v1651_v37  ;;  %v1679_v46 = vld [vmem:[%s1901_s6] sm:$0x1] }
  0x22   :  { %232 = vmatpush1.bf16.msra.mxu1 %v1653_v38 }
  0x23   :  { %145 = vmatpush1.bf16.msra.mxu0 %v1626_v17  ;;  %233 = vmatprep.subr.bf16.mxu1 %v1655_v39 }
  0x24   :  { %329 = vmatprep.subr.bf16.mxu0 %v1617_v13 }
  0x26   :  { %234 = vmatpush1.bf16.msra.mxu1 %v1659_v40 }
  0x27   :  { %398 = vmatprep.subr.bf16.mxu1 %v1651_v37 }
  0x2e   :  { %v1421_v5 = vpop.eup %1420 }
  0x2f   :  { %87 = vrot.lane.b32.xlu0 %v1421_v5, %s1542_s5  ;;  %v83_v6 = vmul.f32 0.5, %v1421_v5 }
  0x31   :  { %v84_v7 = vadd.f32 0.5, %v83_v6 }
  0x33   :  { %v85_v10 = vmul.f32 0.0, %v84_v7 }
  0xa1   :  { %v88_v8 = vpop.permute.xlu0 %87 }
  0xa2   :  { %v90_v9 = vmul.f32 %v88_v8, %v84_v7 }
  0xa4   :  { %92 = vrot.lane.b32.xlu0 %v90_v9, %s1543_s0 }
 0x116   :  { %v93_v11 = vpop.permute.xlu0 %92 }
 0x117   :  { %v1614_v12 = vadd.f32 %v93_v11, %v85_v10 }
 0x119   :  { %1422 = vtanh.f32 %v1614_v12 }
 0x126   :  { %v1423_v18 = vpop.eup %1422 }
 0x127   :  { %98 = vrot.lane.b32.xlu1 %v1423_v18, %s1542_s5 }
 0x199   :  { %v99_v19 = vpop.permute.xlu1 %98 }
 0x19a   :  { %v101_v20 = vmul.f32 %v99_v19, %v84_v7 }
 0x19c   :  { %v102_v21 = vpack.c.bf16 %v101_v20, %v101_v20 }
 0x19e   :  { %104 = vrot.lane.b32.xlu1 %v102_v21, %s1543_s0 }
 0x210   :  { %v105_v22 = vpop.permute.xlu1 %104 }
 0x211   :  { %1363 = vmatmul.mubr.msk.bf16.vlgmr.msra.gmra.mxu0 %vm126_vm0, %v105_v22 }
 0x212   :  { %330 = vmatpush1.bf16.msra.mxu0 %v1619_v14  ;;  %349 = vmatprep.mubr.bf16.mxu0 %v1544_v16 }
 0x213   :  { %331 = vmatprep.subr.bf16.mxu0 %v1621_v15 }
 0x216   :  { %332 = vmatpush1.bf16.msra.mxu0 %v1626_v17 }
 0x217   :  { %487 = vmatprep.subr.bf16.mxu0 %v1617_v13 }
 0x2d1   :  { %v164_v24 = vpop.f32.mrf.mxu0 }
 0x2d2   :  { %v171_v25 = vadd.f32 %v164_v24, %v1643_v23 }
 0x2d3   :  { %v166_v26 = vpop.f32.mrf.mxu0 }
 0x2d4   :  { %1424 = vtanh.f32 %v171_v25  ;;  %v287_v47 = vadd.f32 %v166_v26, %v1679_v46 }
 0x2d5   :  { %v168_v27 = vpop.f32.mrf.mxu0 }
 0x2d7   :  { %v169_v28 = vpop.f32.mrf.mxu0 }
 0x2e1   :  { %v1425_v29 = vpop.eup %1424 }
 0x2e2   :  { %177 = vrot.lane.b32.xlu0 %v1425_v29, %s1542_s5  ;;  %v173_v30 = vmul.f32 0.5, %v1425_v29 }
 0x2e4   :  { %v174_v31 = vadd.f32 0.5, %v173_v30 }
 0x2e6   :  { %v175_v34 = vmul.f32 0.0, %v174_v31 }
 0x354   :  { %v178_v32 = vpop.permute.xlu0 %177 }
 0x355   :  { %v180_v33 = vmul.f32 %v178_v32, %v174_v31 }
 0x357   :  { %182 = vrot.lane.b32.xlu1 %v180_v33, %s1543_s0 }
 0x3c9   :  { %v183_v35 = vpop.permute.xlu1 %182 }
 0x3ca   :  { %v1648_v36 = vadd.f32 %v183_v35, %v175_v34 }
 0x3cc   :  { %1426 = vtanh.f32 %v1648_v36 }
 0x3d9   :  { %v1427_v41 = vpop.eup %1426 }
 0x3da   :  { %188 = vrot.lane.b32.xlu0 %v1427_v41, %s1542_s5 }
 0x44c   :  { %v189_v42 = vpop.permute.xlu0 %188 }
 0x44d   :  { %v1665_v43 = vmul.f32 %v189_v42, %v174_v31 }
 0x44f   :  { %v192_v44 = vpack.c.bf16 %v1665_v43, %v1665_v43 }
 0x451   :  { %194 = vrot.lane.b32.xlu1 %v192_v44, %s1543_s0 }
 0x4c3   :  { %v195_v45 = vpop.permute.xlu1 %194 }
 0x4c4   :  { %1368 = vmatmul.mubr.msk.bf16.vlgmr.msra.gmra.mxu1 %vm126_vm0, %v195_v45 }
 0x4c5   :  { %399 = vmatpush1.bf16.msra.mxu1 %v1653_v38  ;;  %418 = vmatprep.mubr.bf16.mxu1 %v1544_v16 }
 0x4c6   :  { %400 = vmatprep.subr.bf16.mxu1 %v1655_v39 }
 0x4c9   :  { %401 = vmatpush1.bf16.msra.mxu1 %v1659_v40 }
 0x4ca   :  { %556 = vmatprep.subr.bf16.mxu1 %v1651_v37 }
 0x584   :  { %v253_v48 = vpop.f32.mrf.mxu1 }
 0x585   :  { %v289_v49 = vadd.f32 %v287_v47, %v253_v48 }
 0x586   :  { %v255_v50 = vpop.f32.mrf.mxu1 }
 0x587   :  { %1428 = vtanh.f32 %v289_v49  ;;  %v288_v2 = vadd.f32 %v255_v50, %v1643_v23 }
 0x588   :  { %v257_v51 = vpop.f32.mrf.mxu1 }
 0x58a   :  { %v258_v52 = vpop.f32.mrf.mxu1 }
 0x594   :  { %v1429_v53 = vpop.eup %1428 }
 0x595   :  { %295 = vrot.lane.b32.xlu0 %v1429_v53, %s1542_s5  ;;  %v291_v54 = vmul.f32 0.5, %v1429_v53 }
 0x597   :  { %v292_v55 = vadd.f32 0.5, %v291_v54 }
 0x599   :  { %v293_v58 = vmul.f32 %v292_v55, %v1614_v12 }
 0x607   :  { %v296_v56 = vpop.permute.xlu0 %295 }
 0x608   :  { %v298_v57 = vmul.f32 %v296_v56, %v292_v55 }
 0x60a   :  { %300 = vrot.lane.b32.xlu1 %v298_v57, %s1543_s0 }
 0x67c   :  { %v301_v59 = vpop.permute.xlu1 %300 }
 0x67d   :  { %v303_v60 = vadd.f32 %v301_v59, %v293_v58 }
 0x67f   :  { %1430 = vtanh.f32 %v303_v60 }
 0x68c   :  { %v1431_v61 = vpop.eup %1430 }
 0x68d   :  { %306 = vrot.lane.b32.xlu0 %v1431_v61, %s1542_s5 }
 0x6ff   :  { %v307_v62 = vpop.permute.xlu0 %306 }
 0x700   :  { %v309_v63 = vmul.f32 %v307_v62, %v292_v55 }
 0x702   :  { %v310_v0 = vpack.c.bf16 %v309_v63, %v309_v63 }
 0x704   :  { %312 = vrot.lane.b32.xlu1 %v310_v0, %s1543_s0 }
 0x776   :  { %v313_v1 = vpop.permute.xlu1 %312 }
 0x777   :  { %1370 = vmatmul.mubr.msk.bf16.vlgmr.msra.gmra.mxu0 %vm126_vm0, %v313_v1 }
 0x778   :  { %488 = vmatpush1.bf16.msra.mxu0 %v1619_v14  ;;  %507 = vmatprep.mubr.bf16.mxu0 %v1544_v16 }
 0x779   :  { %489 = vmatprep.subr.bf16.mxu0 %v1621_v15 }
 0x77c   :  { %490 = vmatpush1.bf16.msra.mxu0 %v1626_v17 }
 0x77d   :  { %645 = vmatprep.subr.bf16.mxu0 %v1617_v13 }
 0x837   :  { %v351_v3 = vpop.f32.mrf.mxu0 }
 0x838   :  { %v358_v4 = vadd.f32 %v351_v3, %v288_v2 }
 0x839   :  { %v353_v5 = vpop.f32.mrf.mxu0 }
 0x83a   :  { %1432 = vtanh.f32 %v358_v4  ;;  %v445_v27 = vadd.f32 %v353_v5, %v1679_v46 }
 0x83b   :  { %v355_v6 = vpop.f32.mrf.mxu0 }
 0x83d   :  { %v356_v7 = vpop.f32.mrf.mxu0 }
 0x847   :  { %v1433_v8 = vpop.eup %1432 }
 0x848   :  { %364 = vrot.lane.b32.xlu0 %v1433_v8, %s1542_s5  ;;  %v360_v9 = vmul.f32 0.5, %v1433_v8 }
 0x84a   :  { %v361_v10 = vadd.f32 0.5, %v360_v9 }
 0x84c   :  { %v362_v18 = vmul.f32 %v361_v10, %v1648_v36 }
 0x8ba   :  { %v365_v11 = vpop.permute.xlu0 %364 }
 0x8bb   :  { %v367_v12 = vmul.f32 %v365_v11, %v361_v10 }
 0x8bd   :  { %369 = vrot.lane.b32.xlu1 %v367_v12, %s1543_s0 }
 0x92f   :  { %v370_v19 = vpop.permute.xlu1 %369 }
 0x930   :  { %v372_v20 = vadd.f32 %v370_v19, %v362_v18 }
 0x932   :  { %1434 = vtanh.f32 %v372_v20 }
 0x93f   :  { %v1435_v21 = vpop.eup %1434 }
 0x940   :  { %375 = vrot.lane.b32.xlu0 %v1435_v21, %s1542_s5 }
 0x9b2   :  { %v376_v22 = vpop.permute.xlu0 %375 }
 0x9b3   :  { %v1698_v24 = vmul.f32 %v376_v22, %v361_v10 }
 0x9b5   :  { %v379_v25 = vpack.c.bf16 %v1698_v24, %v1698_v24 }
 0x9b7   :  { %381 = vrot.lane.b32.xlu1 %v379_v25, %s1543_s0 }
 0xa29   :  { %v382_v26 = vpop.permute.xlu1 %381 }
 0xa2a   :  { %1371 = vmatmul.mubr.msk.bf16.vlgmr.msra.gmra.mxu1 %vm126_vm0, %v382_v26 }
 0xa2b   :  { %557 = vmatpush1.bf16.msra.mxu1 %v1653_v38  ;;  %576 = vmatprep.mubr.bf16.mxu1 %v1544_v16 }
 0xa2c   :  { %558 = vmatprep.subr.bf16.mxu1 %v1655_v39 }
 0xa2f   :  { %559 = vmatpush1.bf16.msra.mxu1 %v1659_v40 }
 0xa30   :  { %714 = vmatprep.subr.bf16.mxu1 %v1651_v37 }
 0xaea   :  { %v420_v28 = vpop.f32.mrf.mxu1 }
 0xaeb   :  { %v447_v29 = vadd.f32 %v445_v27, %v420_v28 }
 0xaec   :  { %v422_v30 = vpop.f32.mrf.mxu1 }
 0xaed   :  { %1436 = vtanh.f32 %v447_v29  ;;  %v446_v52 = vadd.f32 %v422_v30, %v1643_v23 }
 0xaee   :  { %v424_v31 = vpop.f32.mrf.mxu1 }
 0xaf0   :  { %v425_v32 = vpop.f32.mrf.mxu1 }
 0xafa   :  { %v1437_v33 = vpop.eup %1436 }
 0xafb   :  { %453 = vrot.lane.b32.xlu0 %v1437_v33, %s1542_s5  ;;  %v449_v34 = vmul.f32 0.5, %v1437_v33 }
 0xafd   :  { %v450_v35 = vadd.f32 0.5, %v449_v34 }
 0xaff   :  { %v451_v42 = vmul.f32 %v450_v35, %v303_v60 }
 0xb6d   :  { %v454_v36 = vpop.permute.xlu0 %453 }
 0xb6e   :  { %v456_v41 = vmul.f32 %v454_v36, %v450_v35 }
 0xb70   :  { %458 = vrot.lane.b32.xlu1 %v456_v41, %s1543_s0 }
 0xbe2   :  { %v459_v44 = vpop.permute.xlu1 %458 }
 0xbe3   :  { %v461_v45 = vadd.f32 %v459_v44, %v451_v42 }
 0xbe5   :  { %1438 = vtanh.f32 %v461_v45 }
 0xbf2   :  { %v1439_v47 = vpop.eup %1438 }
 0xbf3   :  { %464 = vrot.lane.b32.xlu0 %v1439_v47, %s1542_s5 }
 0xc65   :  { %v465_v48 = vpop.permute.xlu0 %464 }
 0xc66   :  { %v467_v49 = vmul.f32 %v465_v48, %v450_v35 }
 0xc68   :  { %v468_v50 = vpack.c.bf16 %v467_v49, %v467_v49 }
 0xc6a   :  { %470 = vrot.lane.b32.xlu1 %v468_v50, %s1543_s0 }
 0xcdc   :  { %v471_v51 = vpop.permute.xlu1 %470 }
 0xcdd   :  { %1372 = vmatmul.mubr.msk.bf16.vlgmr.msra.gmra.mxu0 %vm126_vm0, %v471_v51 }
 0xcde   :  { %646 = vmatpush1.bf16.msra.mxu0 %v1619_v14  ;;  %665 = vmatprep.mubr.bf16.mxu0 %v1544_v16 }
 0xcdf   :  { %647 = vmatprep.subr.bf16.mxu0 %v1621_v15 }
 0xce2   :  { %648 = vmatpush1.bf16.msra.mxu0 %v1626_v17 }
 0xce3   :  { %803 = vmatprep.subr.bf16.mxu0 %v1617_v13 }
 0xd9d   :  { %v509_v53 = vpop.f32.mrf.mxu0 }
 0xd9e   :  { %v516_v54 = vadd.f32 %v509_v53, %v446_v52 }
 0xd9f   :  { %v511_v55 = vpop.f32.mrf.mxu0 }
 0xda0   :  { %1440 = vtanh.f32 %v516_v54  ;;  %v603_v7 = vadd.f32 %v511_v55, %v1679_v46 }
 0xda1   :  { %v513_v56 = vpop.f32.mrf.mxu0 }
 0xda3   :  { %v514_v57 = vpop.f32.mrf.mxu0 }
 0xdad   :  { %v1441_v58 = vpop.eup %1440 }
 0xdae   :  { %522 = vrot.lane.b32.xlu0 %v1441_v58, %s1542_s5  ;;  %v518_v59 = vmul.f32 0.5, %v1441_v58 }
 0xdb0   :  { %v519_v60 = vadd.f32 0.5, %v518_v59 }
 0xdb2   :  { %v520_v63 = vmul.f32 %v519_v60, %v372_v20 }
 0xe20   :  { %v523_v61 = vpop.permute.xlu0 %522 }
 0xe21   :  { %v525_v62 = vmul.f32 %v523_v61, %v519_v60 }
 0xe23   :  { %527 = vrot.lane.b32.xlu1 %v525_v62, %s1543_s0 }
 0xe95   :  { %v528_v0 = vpop.permute.xlu1 %527 }
 0xe96   :  { %v530_v1 = vadd.f32 %v528_v0, %v520_v63 }
 0xe98   :  { %1442 = vtanh.f32 %v530_v1 }
 0xea5   :  { %v1443_v2 = vpop.eup %1442 }
 0xea6   :  { %533 = vrot.lane.b32.xlu0 %v1443_v2, %s1542_s5 }
 0xf18   :  { %v534_v3 = vpop.permute.xlu0 %533 }
 0xf19   :  { %v1724_v4 = vmul.f32 %v534_v3, %v519_v60 }
 0xf1b   :  { %v537_v5 = vpack.c.bf16 %v1724_v4, %v1724_v4 }
 0xf1d   :  { %539 = vrot.lane.b32.xlu1 %v537_v5, %s1543_s0 }
 0xf8f   :  { %v540_v6 = vpop.permute.xlu1 %539 }
 0xf90   :  { %1373 = vmatmul.mubr.msk.bf16.vlgmr.msra.gmra.mxu1 %vm126_vm0, %v540_v6 }
 0xf91   :  { %715 = vmatpush1.bf16.msra.mxu1 %v1653_v38  ;;  %734 = vmatprep.mubr.bf16.mxu1 %v1544_v16 }
 0xf92   :  { %716 = vmatprep.subr.bf16.mxu1 %v1655_v39 }
 0xf95   :  { %717 = vmatpush1.bf16.msra.mxu1 %v1659_v40 }
 0xf96   :  { %872 = vmatprep.subr.bf16.mxu1 %v1651_v37 }
0x1050   :  { %v578_v8 = vpop.f32.mrf.mxu1 }
0x1051   :  { %v605_v9 = vadd.f32 %v603_v7, %v578_v8 }
0x1052   :  { %v580_v10 = vpop.f32.mrf.mxu1 }
0x1053   :  { %1444 = vtanh.f32 %v605_v9  ;;  %v604_v33 = vadd.f32 %v580_v10, %v1643_v23 }
0x1054   :  { %v582_v11 = vpop.f32.mrf.mxu1 }
0x1056   :  { %v583_v12 = vpop.f32.mrf.mxu1 }
0x1060   :  { %v1445_v18 = vpop.eup %1444 }
0x1061   :  { %611 = vrot.lane.b32.xlu0 %v1445_v18, %s1542_s5  ;;  %v607_v19 = vmul.f32 0.5, %v1445_v18 }
0x1063   :  { %v608_v20 = vadd.f32 0.5, %v607_v19 }
0x1065   :  { %v609_v25 = vmul.f32 %v608_v20, %v461_v45 }
0x10d3   :  { %v612_v21 = vpop.permute.xlu0 %611 }
0x10d4   :  { %v614_v22 = vmul.f32 %v612_v21, %v608_v20 }
0x10d6   :  { %616 = vrot.lane.b32.xlu1 %v614_v22, %s1543_s0 }
0x1148   :  { %v617_v26 = vpop.permute.xlu1 %616 }
0x1149   :  { %v619_v27 = vadd.f32 %v617_v26, %v609_v25 }
0x114b   :  { %1446 = vtanh.f32 %v619_v27 }
0x1158   :  { %v1447_v28 = vpop.eup %1446 }
0x1159   :  { %622 = vrot.lane.b32.xlu0 %v1447_v28, %s1542_s5 }
0x11cb   :  { %v623_v29 = vpop.permute.xlu0 %622 }
0x11cc   :  { %v625_v30 = vmul.f32 %v623_v29, %v608_v20 }
0x11ce   :  { %v626_v31 = vpack.c.bf16 %v625_v30, %v625_v30 }
0x11d0   :  { %628 = vrot.lane.b32.xlu1 %v626_v31, %s1543_s0 }
0x1242   :  { %v629_v32 = vpop.permute.xlu1 %628 }
0x1243   :  { %1374 = vmatmul.mubr.msk.bf16.vlgmr.msra.gmra.mxu0 %vm126_vm0, %v629_v32 }
0x1244   :  { %804 = vmatpush1.bf16.msra.mxu0 %v1619_v14  ;;  %823 = vmatprep.mubr.bf16.mxu0 %v1544_v16 }
0x1245   :  { %805 = vmatprep.subr.bf16.mxu0 %v1621_v15 }
0x1248   :  { %806 = vmatpush1.bf16.msra.mxu0 %v1626_v17 }
0x1249   :  { %961 = vmatprep.subr.bf16.mxu0 %v1617_v13 }
0x1303   :  { %v667_v34 = vpop.f32.mrf.mxu0 }
0x1304   :  { %v674_v35 = vadd.f32 %v667_v34, %v604_v33 }
0x1305   :  { %v669_v36 = vpop.f32.mrf.mxu0 }
0x1306   :  { %1448 = vtanh.f32 %v674_v35  ;;  %v761_v58 = vadd.f32 %v669_v36, %v1679_v46 }
0x1307   :  { %v671_v41 = vpop.f32.mrf.mxu0 }
0x1309   :  { %v672_v42 = vpop.f32.mrf.mxu0 }
0x1313   :  { %v1449_v44 = vpop.eup %1448 }
0x1314   :  { %680 = vrot.lane.b32.xlu0 %v1449_v44, %s1542_s5  ;;  %v676_v45 = vmul.f32 0.5, %v1449_v44 }
0x1316   :  { %v677_v47 = vadd.f32 0.5, %v676_v45 }
0x1318   :  { %v678_v50 = vmul.f32 %v677_v47, %v530_v1 }
0x1386   :  { %v681_v48 = vpop.permute.xlu0 %680 }
0x1387   :  { %v683_v49 = vmul.f32 %v681_v48, %v677_v47 }
0x1389   :  { %685 = vrot.lane.b32.xlu1 %v683_v49, %s1543_s0 }
0x13fb   :  { %v686_v51 = vpop.permute.xlu1 %685 }
0x13fc   :  { %v688_v52 = vadd.f32 %v686_v51, %v678_v50 }
0x13fe   :  { %1450 = vtanh.f32 %v688_v52 }
0x140b   :  { %v1451_v53 = vpop.eup %1450 }
0x140c   :  { %691 = vrot.lane.b32.xlu0 %v1451_v53, %s1542_s5 }
0x147e   :  { %v692_v54 = vpop.permute.xlu0 %691 }
0x147f   :  { %v1750_v55 = vmul.f32 %v692_v54, %v677_v47 }
0x1481   :  { %v695_v56 = vpack.c.bf16 %v1750_v55, %v1750_v55 }
0x1483   :  { %697 = vrot.lane.b32.xlu1 %v695_v56, %s1543_s0 }
0x14f5   :  { %v698_v57 = vpop.permute.xlu1 %697 }
0x14f6   :  { %1375 = vmatmul.mubr.msk.bf16.vlgmr.msra.gmra.mxu1 %vm126_vm0, %v698_v57 }
0x14f7   :  { %873 = vmatpush1.bf16.msra.mxu1 %v1653_v38  ;;  %892 = vmatprep.mubr.bf16.mxu1 %v1544_v16 }
0x14f8   :  { %874 = vmatprep.subr.bf16.mxu1 %v1655_v39 }
0x14fb   :  { %875 = vmatpush1.bf16.msra.mxu1 %v1659_v40 }
0x14fc   :  { %1030 = vmatprep.subr.bf16.mxu1 %v1651_v37 }
0x15b6   :  { %v736_v59 = vpop.f32.mrf.mxu1 }
0x15b7   :  { %v763_v60 = vadd.f32 %v761_v58, %v736_v59 }
0x15b8   :  { %v738_v61 = vpop.f32.mrf.mxu1 }
0x15b9   :  { %1452 = vtanh.f32 %v763_v60  ;;  %v762_v19 = vadd.f32 %v738_v61, %v1643_v23 }
0x15ba   :  { %v740_v62 = vpop.f32.mrf.mxu1 }
0x15bc   :  { %v741_v63 = vpop.f32.mrf.mxu1 }
0x15c6   :  { %v1453_v0 = vpop.eup %1452 }
0x15c7   :  { %769 = vrot.lane.b32.xlu0 %v1453_v0, %s1542_s5  ;;  %v765_v1 = vmul.f32 0.5, %v1453_v0 }
0x15c9   :  { %v766_v2 = vadd.f32 0.5, %v765_v1 }
0x15cb   :  { %v767_v6 = vmul.f32 %v766_v2, %v619_v27 }
0x1639   :  { %v770_v3 = vpop.permute.xlu0 %769 }
0x163a   :  { %v772_v5 = vmul.f32 %v770_v3, %v766_v2 }
0x163c   :  { %774 = vrot.lane.b32.xlu1 %v772_v5, %s1543_s0 }
0x16ae   :  { %v775_v7 = vpop.permute.xlu1 %774 }
0x16af   :  { %v777_v8 = vadd.f32 %v775_v7, %v767_v6 }
0x16b1   :  { %1454 = vtanh.f32 %v777_v8 }
0x16be   :  { %v1455_v9 = vpop.eup %1454 }
0x16bf   :  { %780 = vrot.lane.b32.xlu0 %v1455_v9, %s1542_s5 }
0x1731   :  { %v781_v10 = vpop.permute.xlu0 %780 }
0x1732   :  { %v783_v11 = vmul.f32 %v781_v10, %v766_v2 }
0x1734   :  { %v784_v12 = vpack.c.bf16 %v783_v11, %v783_v11 }
0x1736   :  { %786 = vrot.lane.b32.xlu1 %v784_v12, %s1543_s0 }
0x17a8   :  { %v787_v18 = vpop.permute.xlu1 %786 }
0x17a9   :  { %1376 = vmatmul.mubr.msk.bf16.vlgmr.msra.gmra.mxu0 %vm126_vm0, %v787_v18 }
0x17aa   :  { %962 = vmatpush1.bf16.msra.mxu0 %v1619_v14  ;;  %981 = vmatprep.mubr.bf16.mxu0 %v1544_v16 }
0x17ab   :  { %963 = vmatprep.subr.bf16.mxu0 %v1621_v15 }
0x17ae   :  { %964 = vmatpush1.bf16.msra.mxu0 %v1626_v17 }
0x17af   :  { %1119 = vmatprep.subr.bf16.mxu0 %v1617_v13 }
0x1869   :  { %v825_v20 = vpop.f32.mrf.mxu0 }
0x186a   :  { %v832_v21 = vadd.f32 %v825_v20, %v762_v19 }
0x186b   :  { %v827_v22 = vpop.f32.mrf.mxu0 }
0x186c   :  { %1456 = vtanh.f32 %v832_v21  ;;  %v919_v45 = vadd.f32 %v827_v22, %v1679_v46 }
0x186d   :  { %v829_v25 = vpop.f32.mrf.mxu0 }
0x186f   :  { %v830_v26 = vpop.f32.mrf.mxu0 }
0x1879   :  { %v1457_v27 = vpop.eup %1456 }
0x187a   :  { %838 = vrot.lane.b32.xlu0 %v1457_v27, %s1542_s5  ;;  %v834_v28 = vmul.f32 0.5, %v1457_v27 }
0x187c   :  { %v835_v29 = vadd.f32 0.5, %v834_v28 }
0x187e   :  { %v836_v32 = vmul.f32 %v835_v29, %v688_v52 }
0x18ec   :  { %v839_v30 = vpop.permute.xlu0 %838 }
0x18ed   :  { %v841_v31 = vmul.f32 %v839_v30, %v835_v29 }
0x18ef   :  { %843 = vrot.lane.b32.xlu1 %v841_v31, %s1543_s0 }
0x1961   :  { %v844_v33 = vpop.permute.xlu1 %843 }
0x1962   :  { %v846_v34 = vadd.f32 %v844_v33, %v836_v32 }
0x1964   :  { %1458 = vtanh.f32 %v846_v34 }
0x1971   :  { %v1459_v35 = vpop.eup %1458 }
0x1972   :  { %849 = vrot.lane.b32.xlu0 %v1459_v35, %s1542_s5 }
0x19e4   :  { %v850_v36 = vpop.permute.xlu0 %849 }
0x19e5   :  { %v1776_v41 = vmul.f32 %v850_v36, %v835_v29 }
0x19e7   :  { %v853_v42 = vpack.c.bf16 %v1776_v41, %v1776_v41 }
0x19e9   :  { %855 = vrot.lane.b32.xlu1 %v853_v42, %s1543_s0 }
0x1a5b   :  { %v856_v44 = vpop.permute.xlu1 %855 }
0x1a5c   :  { %1377 = vmatmul.mubr.msk.bf16.vlgmr.msra.gmra.mxu1 %vm126_vm0, %v856_v44 }
0x1a5d   :  { %1031 = vmatpush1.bf16.msra.mxu1 %v1653_v38  ;;  %1050 = vmatprep.mubr.bf16.mxu1 %v1544_v16 }
0x1a5e   :  { %1032 = vmatprep.subr.bf16.mxu1 %v1655_v39 }
0x1a61   :  { %1033 = vmatpush1.bf16.msra.mxu1 %v1659_v40 }
0x1a62   :  { %1188 = vmatprep.subr.bf16.mxu1 %v1651_v37 }
0x1b1c   :  { %v894_v47 = vpop.f32.mrf.mxu1 }
0x1b1d   :  { %v921_v48 = vadd.f32 %v919_v45, %v894_v47 }
0x1b1e   :  { %v896_v49 = vpop.f32.mrf.mxu1 }
0x1b1f   :  { %1460 = vtanh.f32 %v921_v48  ;;  %v920_v1 = vadd.f32 %v896_v49, %v1643_v23 }
0x1b20   :  { %v898_v50 = vpop.f32.mrf.mxu1 }
0x1b22   :  { %v899_v51 = vpop.f32.mrf.mxu1 }
0x1b2c   :  { %v1461_v52 = vpop.eup %1460 }
0x1b2d   :  { %927 = vrot.lane.b32.xlu0 %v1461_v52, %s1542_s5  ;;  %v923_v53 = vmul.f32 0.5, %v1461_v52 }
0x1b2f   :  { %v924_v54 = vadd.f32 0.5, %v923_v53 }
0x1b31   :  { %v925_v58 = vmul.f32 %v924_v54, %v777_v8 }
0x1b9f   :  { %v928_v56 = vpop.permute.xlu0 %927 }
0x1ba0   :  { %v930_v57 = vmul.f32 %v928_v56, %v924_v54 }
0x1ba2   :  { %932 = vrot.lane.b32.xlu1 %v930_v57, %s1543_s0 }
0x1c14   :  { %v933_v59 = vpop.permute.xlu1 %932 }
0x1c15   :  { %v935_v37 = vadd.f32 %v933_v59, %v925_v58 }
0x1c17   :  { %1462 = vtanh.f32 %v935_v37 }
0x1c24   :  { %v1463_v60 = vpop.eup %1462 }
0x1c25   :  { %938 = vrot.lane.b32.xlu0 %v1463_v60, %s1542_s5 }
0x1c97   :  { %v939_v61 = vpop.permute.xlu0 %938 }
0x1c98   :  { %v941_v62 = vmul.f32 %v939_v61, %v924_v54 }
0x1c9a   :  { %v942_v63 = vpack.c.bf16 %v941_v62, %v941_v62 }
0x1c9c   :  { %944 = vrot.lane.b32.xlu1 %v942_v63, %s1543_s0 }
0x1d0e   :  { %v945_v0 = vpop.permute.xlu1 %944 }
0x1d0f   :  { %1378 = vmatmul.mubr.msk.bf16.vlgmr.msra.gmra.mxu0 %vm126_vm0, %v945_v0 }
0x1d10   :  { %1120 = vmatpush1.bf16.msra.mxu0 %v1619_v14  ;;  %1139 = vmatprep.mubr.bf16.mxu0 %v1544_v16 }
0x1d11   :  { %1121 = vmatprep.subr.bf16.mxu0 %v1621_v15 }
0x1d14   :  { %1122 = vmatpush1.bf16.msra.mxu0 %v1626_v17 }
0x1d15   :  { %1277 = vmatprep.subr.bf16.mxu0 %v1617_v13 }
0x1dcf   :  { %v983_v2 = vpop.f32.mrf.mxu0 }
0x1dd0   :  { %v990_v3 = vadd.f32 %v983_v2, %v920_v1 }
0x1dd1   :  { %v985_v5 = vpop.f32.mrf.mxu0 }
0x1dd2   :  { %1464 = vtanh.f32 %v990_v3  ;;  %v1077_v27 = vadd.f32 %v985_v5, %v1679_v46 }
0x1dd3   :  { %v987_v6 = vpop.f32.mrf.mxu0 }
0x1dd5   :  { %v988_v7 = vpop.f32.mrf.mxu0 }
0x1ddf   :  { %v1465_v8 = vpop.eup %1464 }
0x1de0   :  { %996 = vrot.lane.b32.xlu0 %v1465_v8, %s1542_s5  ;;  %v992_v9 = vmul.f32 0.5, %v1465_v8 }
0x1de2   :  { %v993_v10 = vadd.f32 0.5, %v992_v9 }
0x1de4   :  { %v994_v18 = vmul.f32 %v993_v10, %v846_v34 }
0x1e52   :  { %v997_v11 = vpop.permute.xlu0 %996 }
0x1e53   :  { %v999_v12 = vmul.f32 %v997_v11, %v993_v10 }
0x1e55   :  { %1001 = vrot.lane.b32.xlu1 %v999_v12, %s1543_s0 }
0x1ec7   :  { %v1002_v19 = vpop.permute.xlu1 %1001 }
0x1ec8   :  { %v1004_v13 = vadd.f32 %v1002_v19, %v994_v18 }
0x1eca   :  { %1466 = vtanh.f32 %v1004_v13 }
0x1ed7   :  { %v1467_v20 = vpop.eup %1466 }
0x1ed8   :  { %1007 = vrot.lane.b32.xlu0 %v1467_v20, %s1542_s5 }
0x1f4a   :  { %v1008_v21 = vpop.permute.xlu0 %1007 }
0x1f4b   :  { %v1802_v22 = vmul.f32 %v1008_v21, %v993_v10 }
0x1f4d   :  { %v1011_v25 = vpack.c.bf16 %v1802_v22, %v1802_v22 }
0x1f4f   :  { %1013 = vrot.lane.b32.xlu1 %v1011_v25, %s1543_s0 }
0x1fc1   :  { %v1014_v26 = vpop.permute.xlu1 %1013 }
0x1fc2   :  { %1379 = vmatmul.mubr.msk.bf16.vlgmr.msra.gmra.mxu1 %vm126_vm0, %v1014_v26 }
0x1fc3   :  { %1189 = vmatpush1.bf16.msra.mxu1 %v1653_v38  ;;  %1208 = vmatprep.mubr.bf16.mxu1 %v1544_v16 }
0x1fc4   :  { %1190 = vmatprep.subr.bf16.mxu1 %v1655_v39 }
0x1fc7   :  { %1191 = vmatpush1.bf16.msra.mxu1 %v1659_v40 }
0x2082   :  { %v1052_v28 = vpop.f32.mrf.mxu1 }
0x2083   :  { %v1079_v29 = vadd.f32 %v1077_v27, %v1052_v28 }
0x2084   :  { %v1054_v30 = vpop.f32.mrf.mxu1 }
0x2085   :  { %1468 = vtanh.f32 %v1079_v29  ;;  %v1078_v50 = vadd.f32 %v1054_v30, %v1643_v23 }
0x2086   :  { %v1056_v31 = vpop.f32.mrf.mxu1 }
0x2088   :  { %v1057_v32 = vpop.f32.mrf.mxu1 }
0x2092   :  { %v1469_v33 = vpop.eup %1468 }
0x2093   :  { %1085 = vrot.lane.b32.xlu0 %v1469_v33, %s1542_s5  ;;  %v1081_v34 = vmul.f32 0.5, %v1469_v33 }
0x2095   :  { %v1082_v35 = vadd.f32 0.5, %v1081_v34 }
0x2097   :  { %v1083_v39 = vmul.f32 %v1082_v35, %v935_v37 }
0x2105   :  { %v1086_v38 = vpop.permute.xlu0 %1085 }
0x2106   :  { %v1088_v36 = vmul.f32 %v1086_v38, %v1082_v35 }
0x2108   :  { %1090 = vrot.lane.b32.xlu1 %v1088_v36, %s1543_s0 }
0x217a   :  { %v1091_v42 = vpop.permute.xlu1 %1090 }
0x217b   :  { %v1093_v40 = vadd.f32 %v1091_v42, %v1083_v39  ;;  %v1369_v39 = vld [vmem:[%s1903_s8] ss:$0 sm:$0xff] }
0x217d   :  { %1470 = vtanh.f32 %v1093_v40 }
0x218a   :  { %v1471_v44 = vpop.eup %1470 }
0x218b   :  { %1096 = vrot.lane.b32.xlu0 %v1471_v44, %s1542_s5 }
0x21fd   :  { %v1097_v45 = vpop.permute.xlu0 %1096 }
0x21fe   :  { %v1099_v47 = vmul.f32 %v1097_v45, %v1082_v35 }
0x2200   :  { %v1100_v48 = vpack.c.bf16 %v1099_v47, %v1099_v47 }
0x2202   :  { %1102 = vrot.lane.b32.xlu1 %v1100_v48, %s1543_s0 }
0x2274   :  { %v1103_v49 = vpop.permute.xlu1 %1102 }
0x2275   :  { %1380 = vmatmul.mubr.msk.bf16.vlgmr.msra.gmra.mxu0 %vm126_vm0, %v1103_v49 }
0x2276   :  { %1278 = vmatpush1.bf16.msra.mxu0 %v1619_v14  ;;  %1297 = vmatprep.mubr.bf16.mxu0 %v1544_v16 }
0x2277   :  { %1279 = vmatprep.subr.bf16.mxu0 %v1621_v15 }
0x227a   :  { %1280 = vmatpush1.bf16.msra.mxu0 %v1626_v17 }
0x2335   :  { %v1141_v51 = vpop.f32.mrf.mxu0 }
0x2336   :  { %v1148_v52 = vadd.f32 %v1141_v51, %v1078_v50 }
0x2337   :  { %v1143_v53 = vpop.f32.mrf.mxu0 }
0x2338   :  { %1472 = vtanh.f32 %v1148_v52  ;;  %v1235_v1 = vadd.f32 %v1143_v53, %v1679_v46 }
0x2339   :  { %v1145_v54 = vpop.f32.mrf.mxu0 }
0x233b   :  { %v1146_v56 = vpop.f32.mrf.mxu0 }
0x2345   :  { %v1473_v57 = vpop.eup %1472 }
0x2346   :  { %1154 = vrot.lane.b32.xlu0 %v1473_v57, %s1542_s5  ;;  %v1150_v58 = vmul.f32 0.5, %v1473_v57 }
0x2348   :  { %v1151_v59 = vadd.f32 0.5, %v1150_v58 }
0x234a   :  { %v1152_v15 = vmul.f32 %v1151_v59, %v1004_v13 }
0x23b8   :  { %v1155_v14 = vpop.permute.xlu0 %1154 }
0x23b9   :  { %v1157_v37 = vmul.f32 %v1155_v14, %v1151_v59 }
0x23bb   :  { %1159 = vrot.lane.b32.xlu1 %v1157_v37, %s1543_s0 }
0x242d   :  { %v1160_v16 = vpop.permute.xlu1 %1159 }
0x242e   :  { %v1162_v17 = vadd.f32 %v1160_v16, %v1152_v15 }
0x2430   :  { %1474 = vtanh.f32 %v1162_v17 }
0x243d   :  { %v1475_v60 = vpop.eup %1474 }
0x243e   :  { %1165 = vrot.lane.b32.xlu0 %v1475_v60, %s1542_s5 }
0x24b0   :  { %v1166_v61 = vpop.permute.xlu0 %1165 }
0x24b1   :  { %v1826_v62 = vmul.f32 %v1166_v61, %v1151_v59 }
0x24b3   :  { %v1169_v63 = vpack.c.bf16 %v1826_v62, %v1826_v62 }
0x24b5   :  { %1171 = vrot.lane.b32.xlu1 %v1169_v63, %s1543_s0 }
0x2527   :  { %v1172_v0 = vpop.permute.xlu1 %1171 }
0x2528   :  { %1381 = vmatmul.mubr.msk.bf16.vlgmr.msra.gmra.mxu1 %vm126_vm0, %v1172_v0 }
0x25e8   :  { %v1210_v2 = vpop.f32.mrf.mxu1 }
0x25e9   :  { %v1237_v3 = vadd.f32 %v1235_v1, %v1210_v2 }
0x25ea   :  { %v1212_v5 = vpop.f32.mrf.mxu1 }
0x25eb   :  { %1476 = vtanh.f32 %v1237_v3  ;;  %v1236_v27 = vadd.f32 %v1212_v5, %v1643_v23 }
0x25ec   :  { %v1214_v6 = vpop.f32.mrf.mxu1 }
0x25ee   :  { %v1215_v7 = vpop.f32.mrf.mxu1 }
0x25f8   :  { %v1477_v8 = vpop.eup %1476 }
0x25f9   :  { %1243 = vrot.lane.b32.xlu0 %v1477_v8, %s1542_s5  ;;  %v1239_v9 = vmul.f32 0.5, %v1477_v8 }
0x25fb   :  { %v1240_v10 = vadd.f32 0.5, %v1239_v9 }
0x25fd   :  { %v1241_v18 = vmul.f32 %v1240_v10, %v1093_v40 }
0x266b   :  { %v1244_v11 = vpop.permute.xlu0 %1243 }
0x266c   :  { %v1246_v12 = vmul.f32 %v1244_v11, %v1240_v10 }
0x266e   :  { %1248 = vrot.lane.b32.xlu1 %v1246_v12, %s1543_s0 }
0x26e0   :  { %v1249_v19 = vpop.permute.xlu1 %1248 }
0x26e1   :  { %v1251_v13 = vadd.f32 %v1249_v19, %v1241_v18 }
0x26e3   :  { %1478 = vtanh.f32 %v1251_v13 }
0x26f0   :  { %v1479_v46 = vpop.eup %1478 }
0x26f1   :  { %1254 = vrot.lane.b32.xlu0 %v1479_v46, %s1542_s5 }
0x2763   :  { %v1255_v20 = vpop.permute.xlu0 %1254 }
0x2764   :  { %v1257_v21 = vmul.f32 %v1255_v20, %v1240_v10 }
0x2766   :  { %v1258_v25 = vpack.c.bf16 %v1257_v21, %v1257_v21 }
0x2768   :  { %1260 = vrot.lane.b32.xlu1 %v1258_v25, %s1543_s0 }
0x27da   :  { %v1261_v26 = vpop.permute.xlu1 %1260 }
0x27db   :  { %1382 = vmatmul.mubr.msk.bf16.vlgmr.msra.gmra.mxu0 %vm126_vm0, %v1261_v26 }
0x289b   :  { %v1299_v28 = vpop.f32.mrf.mxu0 }
0x289c   :  { %v1305_v29 = vadd.f32 %v1299_v28, %v1236_v27 }
0x289d   :  { %v1301_v30 = vpop.f32.mrf.mxu0 }
0x289e   :  { %1480 = vtanh.f32 %v1305_v29 }
0x289f   :  { %v1302_v31 = vpop.f32.mrf.mxu0 }
0x28a1   :  { %v1303_v32 = vpop.f32.mrf.mxu0 }
0x28ab   :  { %v1481_v33 = vpop.eup %1480 }
0x28ac   :  { %1311 = vrot.lane.b32.xlu0 %v1481_v33, %s1542_s5  ;;  %v1307_v34 = vmul.f32 0.5, %v1481_v33 }
0x28ae   :  { %v1308_v35 = vadd.f32 0.5, %v1307_v34 }
0x28b0   :  { %v1309_v23 = vmul.f32 %v1308_v35, %v1162_v17 }
0x291e   :  { %v1312_v38 = vpop.permute.xlu0 %1311 }
0x291f   :  { %v1314_v36 = vmul.f32 %v1312_v38, %v1308_v35 }
0x2921   :  { %1316 = vrot.lane.b32.xlu1 %v1314_v36, %s1543_s0 }
0x2925   :  { %265 = vrot.lane.b32.xlu1 %v1369_v39, %s1545_s28 }
0x2993   :  { %v1317_v42 = vpop.permute.xlu1 %1316 }
0x2994   :  { %v1319_v40 = vadd.f32 %v1317_v42, %v1309_v23 }
0x2996   :  { %1482 = vtanh.f32 %v1319_v40 }
0x2997   :  { %v266_v45 = vpop.permute.xlu1 %265 }
0x2998   :  { %v268_v47 = vmul.f32 %v266_v45, %v1665_v43  ;;  %v427_v48 = vmul.f32 %v1698_v24, %v266_v45  ;;  %v585_v49 = vmul.f32 %v1724_v4, %v266_v45  ;;  %v743_v50 = vmul.f32 %v1750_v55, %v266_v45 }
0x2999   :  { %v901_v51 = vmul.f32 %v1776_v41, %v266_v45  ;;  %v1059_v43 = vmul.f32 %v1802_v22, %v266_v45  ;;  %v1217_v24 = vmul.f32 %v1826_v62, %v266_v45 }
0x29a3   :  { %v1483_v44 = vpop.eup %1482 }
0x29a4   :  { %1322 = vrot.lane.b32.xlu0 %v1483_v44, %s1542_s5 }
0x29a8   :  { %270 = vrot.lane.b32.xlu0 %v268_v47, %s1543_s0 }
0x29ac   :  { %429 = vrot.lane.b32.xlu0 %v427_v48, %s1543_s0 }
0x29b0   :  { %587 = vrot.lane.b32.xlu0 %v585_v49, %s1543_s0 }
0x29b4   :  { %745 = vrot.lane.b32.xlu0 %v743_v50, %s1543_s0 }
0x29b8   :  { %903 = vrot.lane.b32.xlu0 %v901_v51, %s1543_s0 }
0x29bc   :  { %1061 = vrot.lane.b32.xlu0 %v1059_v43, %s1543_s0 }
0x29c0   :  { %1219 = vrot.lane.b32.xlu0 %v1217_v24, %s1543_s0 }
0x2a16   :  { %v1323_v52 = vpop.permute.xlu0 %1322 }
0x2a17   :  { %v1325_v4 = vmul.f32 %v1323_v52, %v1308_v35 }
0x2a19   :  { %v1326_v53 = vmul.f32 %v1325_v4, %v266_v45 }
0x2a1a   :  { %v271_v54 = vpop.permute.xlu0 %270 }
0x2a1b   :  { %1328 = vrot.lane.b32.xlu0 %v1326_v53, %s1543_s0  ;;  %v274_v55 = vsel %vm273_vm1, %v271_v54, 0.0 }
0x2a1c   :  { %275 = vadd.xlane.f32.xlu1 %v274_v55 }
0x2a1e   :  { %v430_v41 = vpop.permute.xlu0 %429 }
0x2a1f   :  { %v432_v60 = vsel %vm273_vm1, %v430_v41, 0.0 }
0x2a22   :  { %v588_v56 = vpop.permute.xlu0 %587 }
0x2a23   :  { %v590_v22 = vsel %vm273_vm1, %v588_v56, 0.0 }
0x2a24   :  { %591 = vadd.xlane.f32.xlu1 %v590_v22 }
0x2a26   :  { %v746_v57 = vpop.permute.xlu0 %745 }
0x2a27   :  { %v748_v58 = vsel %vm273_vm1, %v746_v57, 0.0 }
0x2a28   :  { %749 = vadd.xlane.f32.xlu1 %v748_v58 }
0x2a2a   :  { %v904_v59 = vpop.permute.xlu0 %903 }
0x2a2b   :  { %v906_v14 = vsel %vm273_vm1, %v904_v59, 0.0 }
0x2a2c   :  { %907 = vadd.xlane.f32.xlu1 %v906_v14 }
0x2a2e   :  { %v1062_v37 = vpop.permute.xlu0 %1061 }
0x2a2f   :  { %v1064_v15 = vsel %vm273_vm1, %v1062_v37, 0.0 }
0x2a30   :  { %1065 = vadd.xlane.f32.xlu1 %v1064_v15 }
0x2a32   :  { %v1220_v16 = vpop.permute.xlu0 %1219 }
0x2a33   :  { %v1222_v17 = vsel %vm273_vm1, %v1220_v16, 0.0 }
0x2a34   :  { %1223 = vadd.xlane.f32.xlu1 %v1222_v17 }
0x2a3a   :  { %433 = vadd.xlane.f32.xlu0 %v432_v60 }
0x2a8d   :  { %v1329_v61 = vpop.permute.xlu0 %1328 }
0x2a8e   :  { %v1331_v62 = vsel %vm273_vm1, %v1329_v61, 0.0 }
0x2a8f   :  { %1332 = vadd.xlane.f32.xlu1 %v1331_v62 }
0x2aa5   :  { %v276_v63 = vpop.xlane.xlu1 %275 }
0x2aa6   :  { %v277_v0 = vrot.slane %v276_v63, 4 }
0x2aa8   :  { %v278_v1 = vadd.f32 %v277_v0, %v276_v63 }
0x2aaa   :  { %v279_v2 = vrot.slane %v278_v1, 2 }
0x2aac   :  { %v280_v3 = vadd.f32 %v279_v2, %v278_v1 }
0x2aad   :  { %v592_v5 = vpop.xlane.xlu1 %591 }
0x2aae   :  { %v281_v6 = vrot.slane %v280_v3, 1  ;;  %v593_v11 = vrot.slane %v592_v5, 4 }
0x2ab0   :  { %v282_v7 = vadd.f32 %v281_v6, %v280_v3  ;;  %v594_v46 = vadd.f32 %v593_v11, %v592_v5 }
0x2ab1   :  { %v750_v8 = vpop.xlane.xlu1 %749 }
0x2ab2   :  { %1383 = vpush %v282_v7  ;;  %v751_v12 = vrot.slane %v750_v8, 4  ;;  %v595_v27 = vrot.slane %v594_v46, 2 }
0x2ab4   :  { %v752_v21 = vadd.f32 %v751_v12, %v750_v8  ;;  %v596_v38 = vadd.f32 %v595_v27, %v594_v46 }
0x2ab5   :  { %v908_v9 = vpop.xlane.xlu1 %907 }
0x2ab6   :  { %v909_v18 = vrot.slane %v908_v9, 4  ;;  %v753_v30 = vrot.slane %v752_v21, 2  ;;  %v597_v44 = vrot.slane %v596_v38, 1 }
0x2ab8   :  { %v910_v25 = vadd.f32 %v909_v18, %v908_v9  ;;  %v754_v39 = vadd.f32 %v753_v30, %v752_v21  ;;  %v598_v43 = vadd.f32 %v597_v44, %v596_v38 }
0x2ab9   :  { %v1066_v10 = vpop.xlane.xlu1 %1065 }
0x2aba   :  { %v1067_v13 = vrot.slane %v1066_v10, 4  ;;  %v911_v32 = vrot.slane %v910_v25, 2  ;;  %v755_v48 = vrot.slane %v754_v39, 1 }
0x2abc   :  { %v1068_v26 = vadd.f32 %v1067_v13, %v1066_v10  ;;  %v912_v23 = vadd.f32 %v911_v32, %v910_v25  ;;  %v756_v52 = vadd.f32 %v755_v48, %v754_v39 }
0x2abd   :  { %v1224_v19 = vpop.xlane.xlu1 %1223 }
0x2abe   :  { %v1225_v20 = vrot.slane %v1224_v19, 4  ;;  %v1069_v33 = vrot.slane %v1068_v26, 2  ;;  %v913_v49 = vrot.slane %v912_v23, 1 }
0x2ac0   :  { %v1226_v28 = vadd.f32 %v1225_v20, %v1224_v19  ;;  %v1070_v40 = vadd.f32 %v1069_v33, %v1068_v26  ;;  %v914_v4 = vadd.f32 %v913_v49, %v912_v23 }
0x2ac2   :  { %v1227_v35 = vrot.slane %v1226_v28, 2  ;;  %v1071_v51 = vrot.slane %v1070_v40, 1 }
0x2ac3   :  { %v434_v29 = vpop.xlane.xlu0 %433 }
0x2ac4   :  { %v435_v31 = vrot.slane %v434_v29, 4  ;;  %v1228_v45 = vadd.f32 %v1227_v35, %v1226_v28  ;;  %v1072_v53 = vadd.f32 %v1071_v51, %v1070_v40 }
0x2ac6   :  { %v436_v34 = vadd.f32 %v435_v31, %v434_v29  ;;  %v1229_v24 = vrot.slane %v1228_v45, 1 }
0x2ac8   :  { %v437_v36 = vrot.slane %v436_v34, 2  ;;  %v1230_v54 = vadd.f32 %v1229_v24, %v1228_v45 }
0x2aca   :  { %v438_v42 = vadd.f32 %v437_v36, %v436_v34 }
0x2acc   :  { %v439_v47 = vrot.slane %v438_v42, 1 }
0x2ace   :  { %v440_v50 = vadd.f32 %v439_v47, %v438_v42 }
0x2ad0   :  { %1385 = vpush %v440_v50 }
0x2ad1   :  { %1387 = vpush %v598_v43 }
0x2ad2   :  { %1389 = vpush %v756_v52 }
0x2ad3   :  { %1391 = vpush %v914_v4 }
0x2ad4   :  { %1393 = vpush %v1072_v53 }
0x2ad5   :  { %1395 = vpush %v1230_v54 }
0x2ae3   :  { %s1384_s8 = spop %1383 }
0x2ae4   :  { %s284_s10 = sadd.f32 %s1384_s8, %s1896_s1 }
0x2ae6   :  { %286 = sst [smem:[#allocation9]] %s284_s10  ;;  %s1546_s10 = smov [#allocation9]  }
0x2b01   :  { %s1386_s11 = spop %1385 }
0x2b02   :  { %s442_s14 = sadd.f32 %s1386_s11, %s1896_s1  ;;  %s1388_s15 = spop %1387 }
0x2b03   :  { %s600_s18 = sadd.f32 %s1388_s15, %s1896_s1  ;;  %s1390_s19 = spop %1389 }
0x2b04   :  { %444 = sst [smem:[#allocation9 + $0x1]] %s442_s14  ;;  %s1392_s20 = spop %1391 }
0x2b05   :  { %602 = sst [smem:[#allocation9 + $0x2]] %s600_s18  ;;  %s1394_s23 = spop %1393 }
0x2b06   :  { %s758_s22 = sadd.f32 %s1390_s19, %s1896_s1  ;;  %s1396_s0 = spop %1395 }
0x2b07   :  { %s916_s5 = sadd.f32 %s1392_s20, %s1896_s1 }
0x2b08   :  { %760 = sst [smem:[#allocation9 + $0x3]] %s758_s22 }
0x2b09   :  { %918 = sst [smem:[#allocation9 + $0x4]] %s916_s5 }
0x2b0a   :  { %s1074_s7 = sadd.f32 %s1394_s23, %s1896_s1 }
0x2b0b   :  { %s1232_s27 = sadd.f32 %s1396_s0, %s1896_s1 }
0x2b0c   :  { %1076 = sst [smem:[#allocation9 + $0x5]] %s1074_s7 }
0x2b0d   :  { %1234 = sst [smem:[#allocation9 + $0x6]] %s1232_s27 }
0x2b18   :  { %v1333_v55 = vpop.xlane.xlu1 %1332 }
0x2b19   :  { %v1334_v41 = vrot.slane %v1333_v55, 4 }
0x2b1b   :  { %v1335_v56 = vadd.f32 %v1334_v41, %v1333_v55 }
0x2b1d   :  { %v1336_v22 = vrot.slane %v1335_v56, 2 }
0x2b1f   :  { %v1337_v57 = vadd.f32 %v1336_v22, %v1335_v56 }
0x2b21   :  { %v1338_v58 = vrot.slane %v1337_v57, 1 }
0x2b23   :  { %v1339_v59 = vadd.f32 %v1338_v58, %v1337_v57 }
0x2b25   :  { %1397 = vpush %v1339_v59 }
0x2b56   :  { %s1398_s28 = spop %1397 }
0x2b57   :  { %s1341_s30 = sadd.f32 %s1398_s28, %s1896_s1 }
0x2b59   :  { %1343 = sst [smem:[#allocation9 + $0x7]] %s1341_s30 }
0x2b5a   :  { %1351 = dma.smem_to_hbm %s1546_s10, 16, %s1904_s9, [#allocation6]  }
0x2b5b   :  { %1536 = dma.done.wait [#allocation6], 16  }
0x2b5c   :  { %1537 = vsyncadd [#allocation6], 4294967280 }
0x2b5d   :  { %1355 = sfence }
0x2b5e   :  { %1356 = vsyncpa [#allocation5], 1 }
0x2b5f   :  { %1357 = vsyncpa [#allocation8], 1 }
0x2b60   :  { %1358 = vsyncpa [#allocation6], 1 }

</bundles_post_ra>
